<compile_context>
chip_gen: v6e
topology: v6e:2x2x1
jax: 0.10.0
libtpu: 0.0.40
codegen_flags: <defaults>
</compile_context>

<pallas_src>
import jax
import jax.numpy as jnp
from jax.experimental import pallas as pl
from jax.experimental.pallas import tpu as pltpu

BN_EPS = 1e-5  # PyTorch BatchNorm1d default eps


def _round_up(v, m):
    return ((v + m - 1) // m) * m


def _choose_tiles(n):
    """Node-dim padding and (row-tile, k-tile) sizes: lane-dense, 512 tiles for big N."""
    n_pad = _round_up(n, 128)
    if n_pad <= 512:
        return n_pad, n_pad, n_pad          # single lane-dense tile
    n_pad = _round_up(n, 512)
    return n_pad, 512, 512


def _pick_vmem_limit():
    """Generation-aware scoped-VMEM budget (~3/4 of physical, capped at 96 MiB)."""
    try:
        cap = int(pltpu.get_tpu_info().vmem_capacity_bytes)
        if cap > 0:
            return min(cap * 3 // 4, 96 * 1024 * 1024)
    except Exception:                        # not on a TPU (e.g. interpret mode)
        pass
    return 64 * 1024 * 1024


# --------------------------------------------------------------------------------------
# Pass 1 (per layer): [fused BN+ReLU of the previous layer] -> DenseSAGEConv
#                     (aggregation + stacked feature matmul) -> BN partial statistics.
# --------------------------------------------------------------------------------------
def _make_sage_conv_kernel(*, tn, cin_pad, n_valid, fuse_input_bn):
    def kernel(a_ref, xnb_ref, xroot_ref, scale_ref, shift_ref, w_ref, b_ref,   # inputs
               h_ref, stats_ref,                                                # outputs
               acc_ref, deg_ref, feat_ref):                                     # scratch
        # NOTE: program_id / num_programs hoisted out of the pl.when bodies.
        k = pl.program_id(2)
        last_k = pl.num_programs(2) - 1
        row0 = pl.program_id(1) * tn

        def load_x(ref):
            v = ref[...]                                           # bf16 pre-BN activations
            if not fuse_input_bn:
                return v
            # previous layer's BatchNorm(train)+ReLU, pre-folded to per-channel scale/shift
            vf = v.astype(jnp.float32) * scale_ref[...] + shift_ref[...]
            return jnp.maximum(vf, 0.0).astype(jnp.bfloat16)

        a_t = a_ref[...]                                           # (tn, tk) bf16, 0/1
        xnb = load_x(xnb_ref)                                      # (tk, cin_pad) bf16

        @pl.when(k == 0)
        def _():
            acc_ref[...] = jnp.zeros_like(acc_ref)
            deg_ref[...] = jnp.zeros_like(deg_ref)
            # stash the root features once -> no concatenate in the epilogue
            feat_ref[:, cin_pad:] = load_x(xroot_ref)

        acc_ref[...] += jnp.dot(a_t, xnb, preferred_element_type=jnp.float32)
        deg_ref[...] += jnp.sum(a_t.astype(jnp.float32), axis=-1, keepdims=True)

        @pl.when(k == last_k)
        def _():
            inv_deg = 1.0 / jnp.maximum(deg_ref[...], 1.0)         # exact divide
            feat_ref[:, :cin_pad] = (acc_ref[...] * inv_deg).astype(jnp.bfloat16)
            # stacked [agg | x_root] @ [W_rel ; W_root]: single K = 2*cin_pad MXU matmul
            h = jnp.dot(feat_ref[...], w_ref[...],
                        preferred_element_type=jnp.float32) + b_ref[...]
            h_ref[...] = h.astype(h_ref.dtype)                     # pre-BN h, bf16

            # One-pass BatchNorm partial sums over the valid rows of this tile.
            rows = row0 + jax.lax.broadcasted_iota(jnp.int32, (tn, 1), 0)
            hv = h * (rows < n_valid).astype(jnp.float32)
            stats_ref[0:1, :] = jnp.sum(hv, axis=0, keepdims=True)      # sum
            stats_ref[1:2, :] = jnp.sum(hv * h, axis=0, keepdims=True)  # sum of squares

    return kernel


def _sage_conv_layer(x_p, a_p, scale, shift, layer, *, n_valid, n_pad, tn, tk,
                     fuse_input_bn, vmem_limit):
    B = x_p.shape[0]
    cin_pad = layer['cin_pad']
    cout_pad = layer['cout_pad']
    n_i = n_pad // tn
    n_k = n_pad // tk

    kernel = _make_sage_conv_kernel(tn=tn, cin_pad=cin_pad, n_valid=n_valid,
                                    fuse_input_bn=fuse_input_bn)
    h, stats = pl.pallas_call(
        kernel,
        grid=(B, n_i, n_k),
        in_specs=[
            pl.BlockSpec((None, tn, tk), lambda b, i, k: (b, i, k)),        # adjacency tile
            pl.BlockSpec((None, tk, cin_pad), lambda b, i, k: (b, k, 0)),   # x (neighbour rows)
            pl.BlockSpec((None, tn, cin_pad), lambda b, i, k: (b, i, 0)),   # x (root rows)
            pl.BlockSpec((1, cin_pad), lambda b, i, k: (0, 0)),             # folded BN scale
            pl.BlockSpec((1, cin_pad), lambda b, i, k: (0, 0)),             # folded BN shift
            pl.BlockSpec((2 * cin_pad, cout_pad), lambda b, i, k: (0, 0)),  # [W_rel;W_root]
            pl.BlockSpec((1, cout_pad), lambda b, i, k: (0, 0)),            # bias
        ],
        out_specs=[
            pl.BlockSpec((None, tn, cout_pad), lambda b, i, k: (b, i, 0)),           # h (bf16)
            pl.BlockSpec((None, None, 2, cout_pad), lambda b, i, k: (b, i, 0, 0)),   # BN partials
        ],
        out_shape=[
            jax.ShapeDtypeStruct((B, n_pad, cout_pad), jnp.bfloat16),
            jax.ShapeDtypeStruct((B, n_i, 2, cout_pad), jnp.float32),
        ],
        scratch_shapes=[
            pltpu.VMEM((tn, cin_pad), jnp.float32),        # a @ x accumulator
            pltpu.VMEM((tn, 1), jnp.float32),              # degree accumulator
            pltpu.VMEM((tn, 2 * cin_pad), jnp.bfloat16),   # stacked-feature staging
        ],
        compiler_params=pltpu.CompilerParams(
            dimension_semantics=("parallel", "parallel", "arbitrary"),
            vmem_limit_bytes=vmem_limit),
    )(a_p, x_p, x_p, scale, shift, layer['w'], layer['b'])
    return h, stats


# --------------------------------------------------------------------------------------
# Final epilogue (last layer only): BatchNorm normalize (pre-folded scale/shift) + ReLU.
# --------------------------------------------------------------------------------------
def _bn_relu_kernel(h_ref, scale_ref, shift_ref, o_ref):
    h = h_ref[...].astype(jnp.float32)
    o_ref[...] = jnp.maximum(h * scale_ref[...] + shift_ref[...], 0.0).astype(o_ref.dtype)


def _bn_relu(h, scale, shift, *, n_pad, tn, vmem_limit):
    B, _, cout_pad = h.shape
    n_i = n_pad // tn
    return pl.pallas_call(
        _bn_relu_kernel,
        grid=(B, n_i),
        in_specs=[
            pl.BlockSpec((None, tn, cout_pad), lambda b, i: (b, i, 0)),
            pl.BlockSpec((1, cout_pad), lambda b, i: (0, 0)),
            pl.BlockSpec((1, cout_pad), lambda b, i: (0, 0)),
        ],
        out_specs=pl.BlockSpec((None, tn, cout_pad), lambda b, i: (b, i, 0)),
        out_shape=jax.ShapeDtypeStruct((B, n_pad, cout_pad), jnp.float32),
        compiler_params=pltpu.CompilerParams(
            dimension_semantics=("parallel", "parallel"),
            vmem_limit_bytes=vmem_limit),
    )(h, scale, shift)


# --------------------------------------------------------------------------------------
# Parameter handling / forward pass.
# --------------------------------------------------------------------------------------
def init_gnn_params(key, num_layer, in_dim, hidden_dim, out_dim):
    """Deterministic parameter init matching the module's layer shapes."""
    params = []
    for i in range(num_layer):
        if i == 0:
            ci, co = in_dim, hidden_dim
        elif i == num_layer - 1:
            ci, co = hidden_dim, out_dim
        else:
            ci, co = hidden_dim, hidden_dim
        key, k1, k2, k3 = jax.random.split(key, 4)
        bound = 1.0 / jnp.sqrt(jnp.float32(ci))
        params.append(dict(
            w_rel=jax.random.uniform(k1, (ci, co), jnp.float32, -bound, bound),
            w_root=jax.random.uniform(k2, (ci, co), jnp.float32, -bound, bound),
            b_root=jax.random.uniform(k3, (co,), jnp.float32, -bound, bound),
            gamma=jnp.ones((co,), jnp.float32),    # BatchNorm1d weight init
            beta=jnp.zeros((co,), jnp.float32),    # BatchNorm1d bias init
        ))
    return params


def _prepare_layer_params(params):
    """Pad channels to lane multiples, stack [W_rel; W_root], cast matmul weights to bf16."""
    layers = []
    for p in params:
        cin, cout = p['w_rel'].shape
        cin_pad = _round_up(cin, 128)
        cout_pad = _round_up(cout, 128)

        def pad2(w):
            return jnp.pad(w, ((0, cin_pad - cin), (0, cout_pad - cout)))

        w = jnp.concatenate([pad2(p['w_rel']), pad2(p['w_root'])],
                            axis=0).astype(jnp.bfloat16)          # (2*cin_pad, cout_pad)
        layers.append(dict(
            w=w,
            b=jnp.pad(p['b_root'], (0, cout_pad - cout)).reshape(1, cout_pad).astype(jnp.float32),
            gamma=jnp.pad(p['gamma'], (0, cout_pad - cout)).astype(jnp.float32),
            beta=jnp.pad(p['beta'], (0, cout_pad - cout)).astype(jnp.float32),
            cin_pad=cin_pad, cout_pad=cout_pad))
    return layers


def gnn_forward(params, x, a, mask=None):
    """[DenseSAGEConv -> BatchNorm1d(train) -> ReLU] * num_layer (BN+ReLU fused forward)."""
    assert mask is None  # TODO(synk): DenseSAGEConv mask path not implemented
    B, N, cin = x.shape
    n_pad, tn, tk = _choose_tiles(N)
    layers = _prepare_layer_params(params)
    vmem_limit = _pick_vmem_limit()

    cin_pad0 = layers[0]['cin_pad']
    a_p = jnp.pad(a.astype(jnp.bfloat16), ((0, 0), (0, n_pad - N), (0, n_pad - N)))
    x_p = jnp.pad(x.astype(jnp.bfloat16), ((0, 0), (0, n_pad - N), (0, cin_pad0 - cin)))

    # Layer 0 takes raw features: identity placeholders (statically skipped in-kernel).
    scale = jnp.ones((1, cin_pad0), jnp.float32)
    shift = jnp.zeros((1, cin_pad0), jnp.float32)

    m = float(B * N)   # BatchNorm1d(train) statistics are over all B*N valid rows
    for li, layer in enumerate(layers):
        x_p, stats = _sage_conv_layer(
            x_p, a_p, scale, shift, layer, n_valid=N, n_pad=n_pad, tn=tn, tk=tk,
            fuse_input_bn=(li > 0), vmem_limit=vmem_limit)
        # Fold the train-mode BN (biased variance) + gamma/beta into per-channel scale/shift,
        # applied either fused into the next layer's conv or by the final epilogue pass.
        # (One-pass variance; clamped at 0 so it cannot NaN.)
        s = jnp.sum(stats, axis=(0, 1))                     # (2, cout_pad)
        mean = s[0] / m
        var = jnp.maximum(s[1] / m - mean * mean, 0.0)
        inv = jax.lax.rsqrt(var + BN_EPS)
        scale = (layer['gamma'] * inv).reshape(1, -1)
        shift = (layer['beta'] - mean * layer['gamma'] * inv).reshape(1, -1)

    y = _bn_relu(x_p, scale, shift, n_pad=n_pad, tn=tn, vmem_limit=vmem_limit)
    cout = params[-1]['w_rel'].shape[1]
    return y[:, :N, :cout]


def gnn_reference(params, x, a):
    """Pure-JAX f32 reference of the PyTorch module forward (train-mode BatchNorm)."""
    hp = jax.lax.Precision.HIGHEST
    for p in params:
        deg = jnp.maximum(jnp.sum(a, axis=-1, keepdims=True), 1.0)
        agg = jnp.einsum('bij,bjc->bic', a, x, precision=hp) / deg
        h = (jnp.einsum('bnc,co->bno', agg, p['w_rel'], precision=hp)
             + jnp.einsum('bnc,co->bno', x, p['w_root'], precision=hp)
             + p['b_root'])
        mean = jnp.mean(h, axis=(0, 1))
        var = jnp.mean(jnp.square(h - mean), axis=(0, 1))   # biased variance
        y = (h - mean) * jax.lax.rsqrt(var + BN_EPS) * p['gamma'] + p['beta']
        x = jnp.maximum(y, 0.0)
    return x


if __name__ == "__main__":
    key = jax.random.PRNGKey(0)
    k_params, k_x, k_a = jax.random.split(key, 3)

    # Small shapes consistent with the module's forward: x (B, N, C_in), a (B, N, N).
    B, N = 2, 16
    num_layer, in_dim, hidden_dim, out_dim = 3, 8, 32, 16

    params = init_gnn_params(k_params, num_layer, in_dim, hidden_dim, out_dim)

    x = jax.random.normal(k_x, (B, N, in_dim), jnp.float32)
    # Random symmetric dense adjacency with self loops (exactly 0/1 -> lossless in bf16).
    a_raw = (jax.random.uniform(k_a, (B, N, N)) > 0.5).astype(jnp.float32)
    a = jnp.clip(a_raw + jnp.transpose(a_raw, (0, 2, 1)) + jnp.eye(N)[None], 0.0, 1.0)

    out = jax.jit(gnn_forward)(params, x, a)
    out = jax.block_until_ready(out)

    assert out.shape == (B, N, out_dim), out.shape
    assert bool(jnp.all(jnp.isfinite(out)))

    # Loose tolerance: bf16 MXU inputs / bf16 inter-layer activations vs an f32 reference.
    ref = gnn_reference(params, x, a)
    err = float(jnp.max(jnp.abs(out - ref)))
    assert err < 0.25, f"max abs error vs reference: {err}"

    print("KERNEL_OK")
</pallas_src>

<mosaic_0001>
module attributes {stable_mosaic.version = 11 : i64} {
  func.func @kernel(%arg0: i32, %arg1: i32, %arg2: i32, %arg3: memref<1x128x128xbf16, #tpu.memory_space<vmem>>, %arg4: memref<1x128x128xbf16, #tpu.memory_space<vmem>>, %arg5: memref<1x128x128xbf16, #tpu.memory_space<vmem>>, %arg6: memref<1x128xf32, #tpu.memory_space<vmem>>, %arg7: memref<1x128xf32, #tpu.memory_space<vmem>>, %arg8: memref<256x128xbf16, #tpu.memory_space<vmem>>, %arg9: memref<1x128xf32, #tpu.memory_space<vmem>>, %arg10: memref<1x128x128xbf16, #tpu.memory_space<vmem>>, %arg11: memref<1x1x2x128xf32, #tpu.memory_space<vmem>>, %arg12: memref<128x128xf32, #tpu.memory_space<vmem>>, %arg13: memref<128x1xf32, #tpu.memory_space<vmem>>, %arg14: memref<128x256xbf16, #tpu.memory_space<vmem>>) attributes {dimension_semantics = [#tpu.dimension_semantics<parallel>, #tpu.dimension_semantics<parallel>, #tpu.dimension_semantics<arbitrary>], iteration_bounds = array<i64: 2, 1, 1>, scalar_prefetch = 0 : i64, scratch_operands = 3 : i64, tpu.core_type = #tpu.core_type<tc>, window_params = [{transform_indices = @transform_0, window_bounds = array<i64: 1, 128, 128>}, {transform_indices = @transform_1, window_bounds = array<i64: 1, 128, 128>}, {transform_indices = @transform_2, window_bounds = array<i64: 1, 128, 128>}, {pipeline_mode = #tpu.pipeline_mode<synchronous>, transform_indices = @transform_3, window_bounds = array<i64: 1, 128>}, {pipeline_mode = #tpu.pipeline_mode<synchronous>, transform_indices = @transform_4, window_bounds = array<i64: 1, 128>}, {pipeline_mode = #tpu.pipeline_mode<synchronous>, transform_indices = @transform_5, window_bounds = array<i64: 256, 128>}, {pipeline_mode = #tpu.pipeline_mode<synchronous>, transform_indices = @transform_6, window_bounds = array<i64: 1, 128>}, {transform_indices = @transform_7, window_bounds = array<i64: 1, 128, 128>}, {transform_indices = @transform_8, window_bounds = array<i64: 1, 1, 2, 128>}]} {
    %c128_i32 = arith.constant 128 : i32
    %0 = arith.muli %arg1, %c128_i32 : i32
    %c0 = arith.constant 0 : index
    %c0_0 = arith.constant 0 : index
    %c0_1 = arith.constant 0 : index
    %1 = vector.load %arg3[%c0, %c0_0, %c0_1] : memref<1x128x128xbf16, #tpu.memory_space<vmem>>, vector<1x128x128xbf16>
    %2 = vector.shape_cast %1 : vector<1x128x128xbf16> to vector<128x128xbf16>
    %c0_2 = arith.constant 0 : index
    %c0_3 = arith.constant 0 : index
    %c0_4 = arith.constant 0 : index
    %3 = vector.load %arg4[%c0_2, %c0_3, %c0_4] : memref<1x128x128xbf16, #tpu.memory_space<vmem>>, vector<1x128x128xbf16>
    %4 = vector.shape_cast %3 : vector<1x128x128xbf16> to vector<128x128xbf16>
    %c0_i32 = arith.constant 0 : i32
    %5 = arith.cmpi eq, %arg2, %c0_i32 : i32
    %6 = arith.extui %5 : i1 to i32
    %c0_i32_5 = arith.constant 0 : i32
    %7 = arith.cmpi ne, %6, %c0_i32_5 : i32
    scf.if %7 {
      %cst_17 = arith.constant 0.000000e+00 : f32
      %21 = vector.broadcast %cst_17 : f32 to vector<128x128xf32>
      %c0_18 = arith.constant 0 : index
      %c0_19 = arith.constant 0 : index
      %22 = vector.load %arg12[%c0_18, %c0_19] : memref<128x128xf32, #tpu.memory_space<vmem>>, vector<128x128xf32>
      tpu.vector_store %arg12[%c0_18, %c0_19], %21 {strides = array<i32>} : memref<128x128xf32, #tpu.memory_space<vmem>>, vector<128x128xf32>,
      %cst_20 = arith.constant 0.000000e+00 : f32
      %23 = vector.broadcast %cst_20 : f32 to vector<128x1xf32>
      %c0_21 = arith.constant 0 : index
      %c0_22 = arith.constant 0 : index
      %24 = vector.load %arg13[%c0_21, %c0_22] : memref<128x1xf32, #tpu.memory_space<vmem>>, vector<128x1xf32>
      tpu.vector_store %arg13[%c0_21, %c0_22], %23 {strides = array<i32>} : memref<128x1xf32, #tpu.memory_space<vmem>>, vector<128x1xf32>,
      %c0_23 = arith.constant 0 : index
      %c0_24 = arith.constant 0 : index
      %c0_25 = arith.constant 0 : index
      %25 = vector.load %arg5[%c0_23, %c0_24, %c0_25] : memref<1x128x128xbf16, #tpu.memory_space<vmem>>, vector<1x128x128xbf16>
      %26 = vector.shape_cast %25 : vector<1x128x128xbf16> to vector<128x128xbf16>
      %c0_26 = arith.constant 0 : index
      %c128 = arith.constant 128 : index
      %27 = vector.load %arg14[%c0_26, %c128] : memref<128x256xbf16, #tpu.memory_space<vmem>>, vector<128x128xbf16>
      tpu.vector_store %arg14[%c0_26, %c128], %26 {strides = array<i32>} : memref<128x256xbf16, #tpu.memory_space<vmem>>, vector<128x128xbf16>,
    } else {
    }
    %c0_6 = arith.constant 0 : index
    %c0_7 = arith.constant 0 : index
    %8 = vector.load %arg12[%c0_6, %c0_7] : memref<128x128xf32, #tpu.memory_space<vmem>>, vector<128x128xf32>
    %cst = arith.constant dense<0.000000e+00> : vector<128x128xf32>
    %9 = tpu.matmul %2, %4, %cst {dimension_numbers = #tpu.dot_dimension_numbers<[1], [0], [0], [1], [0, 0, 1, 1], [], []>} : vector<128x128xbf16>, vector<128x128xbf16>, vector<128x128xf32> -> vector<128x128xf32>
    %10 = arith.addf %8, %9 : vector<128x128xf32>
    %c0_8 = arith.constant 0 : index
    %c0_9 = arith.constant 0 : index
    %11 = vector.load %arg12[%c0_8, %c0_9] : memref<128x128xf32, #tpu.memory_space<vmem>>, vector<128x128xf32>
    tpu.vector_store %arg12[%c0_8, %c0_9], %10 {strides = array<i32>} : memref<128x128xf32, #tpu.memory_space<vmem>>, vector<128x128xf32>,
    %c0_10 = arith.constant 0 : index
    %c0_11 = arith.constant 0 : index
    %12 = vector.load %arg13[%c0_10, %c0_11] : memref<128x1xf32, #tpu.memory_space<vmem>>, vector<128x1xf32>
    %13 = arith.extf %2 : vector<128x128xbf16> to vector<128x128xf32>
    %cst_12 = arith.constant dense<0.000000e+00> : vector<128xf32>
    %14 = vector.multi_reduction <add>, %13, %cst_12 [1] : vector<128x128xf32> to vector<128xf32>
    %15 = vector.shape_cast %14 : vector<128xf32> to vector<128x1xf32>
    %16 = arith.addf %12, %15 : vector<128x1xf32>
    %c0_13 = arith.constant 0 : index
    %c0_14 = arith.constant 0 : index
    %17 = vector.load %arg13[%c0_13, %c0_14] : memref<128x1xf32, #tpu.memory_space<vmem>>, vector<128x1xf32>
    tpu.vector_store %arg13[%c0_13, %c0_14], %16 {strides = array<i32>} : memref<128x1xf32, #tpu.memory_space<vmem>>, vector<128x1xf32>,
    %c0_i32_15 = arith.constant 0 : i32
    %18 = arith.cmpi eq, %arg2, %c0_i32_15 : i32
    %19 = arith.extui %18 : i1 to i32
    %c0_i32_16 = arith.constant 0 : i32
    %20 = arith.cmpi ne, %19, %c0_i32_16 : i32
    scf.if %20 {
      %c0_17 = arith.constant 0 : index
      %c0_18 = arith.constant 0 : index
      %21 = vector.load %arg13[%c0_17, %c0_18] : memref<128x1xf32, #tpu.memory_space<vmem>>, vector<128x1xf32>
      %cst_19 = arith.constant 1.000000e+00 : f32
      %22 = vector.broadcast %cst_19 : f32 to vector<128x1xf32>
      %23 = arith.maximumf %21, %22 : vector<128x1xf32>
      %cst_20 = arith.constant 1.000000e+00 : f32
      %24 = vector.broadcast %cst_20 : f32 to vector<128x1xf32>
      %25 = arith.divf %24, %23 : vector<128x1xf32>
      %c0_21 = arith.constant 0 : index
      %c0_22 = arith.constant 0 : index
      %26 = vector.load %arg12[%c0_21, %c0_22] : memref<128x128xf32, #tpu.memory_space<vmem>>, vector<128x128xf32>
      %27 = vector.broadcast %25 : vector<128x1xf32> to vector<128x128xf32>
      %28 = arith.mulf %26, %27 : vector<128x128xf32>
      %29 = arith.truncf %28 : vector<128x128xf32> to vector<128x128xbf16>
      %c0_23 = arith.constant 0 : index
      %c0_24 = arith.constant 0 : index
      %30 = vector.load %arg14[%c0_23, %c0_24] : memref<128x256xbf16, #tpu.memory_space<vmem>>, vector<128x128xbf16>
      tpu.vector_store %arg14[%c0_23, %c0_24], %29 {strides = array<i32>} : memref<128x256xbf16, #tpu.memory_space<vmem>>, vector<128x128xbf16>,
      %c0_25 = arith.constant 0 : index
      %c0_26 = arith.constant 0 : index
      %31 = vector.load %arg14[%c0_25, %c0_26] : memref<128x256xbf16, #tpu.memory_space<vmem>>, vector<128x256xbf16>
      %c0_27 = arith.constant 0 : index
      %c0_28 = arith.constant 0 : index
      %32 = vector.load %arg8[%c0_27, %c0_28] : memref<256x128xbf16, #tpu.memory_space<vmem>>, vector<256x128xbf16>
      %cst_29 = arith.constant dense<0.000000e+00> : vector<128x128xf32>
      %33 = tpu.matmul %31, %32, %cst_29 {dimension_numbers = #tpu.dot_dimension_numbers<[1], [0], [0], [1], [0, 0, 1, 1], [], []>} : vector<128x256xbf16>, vector<256x128xbf16>, vector<128x128xf32> -> vector<128x128xf32>
      %c0_30 = arith.constant 0 : index
      %c0_31 = arith.constant 0 : index
      %34 = vector.load %arg9[%c0_30, %c0_31] : memref<1x128xf32, #tpu.memory_space<vmem>>, vector<1x128xf32>
      %35 = vector.broadcast %34 : vector<1x128xf32> to vector<128x128xf32>
      %36 = arith.addf %33, %35 : vector<128x128xf32>
      %37 = arith.truncf %36 : vector<128x128xf32> to vector<128x128xbf16>
      %c0_32 = arith.constant 0 : index
      %c0_33 = arith.constant 0 : index
      %c0_34 = arith.constant 0 : index
      %38 = vector.load %arg10[%c0_32, %c0_33, %c0_34] : memref<1x128x128xbf16, #tpu.memory_space<vmem>>, vector<1x128x128xbf16>
      %39 = vector.shape_cast %38 : vector<1x128x128xbf16> to vector<128x128xbf16>
      %40 = vector.shape_cast %37 : vector<128x128xbf16> to vector<1x128x128xbf16>
      tpu.vector_store %arg10[%c0_32, %c0_33, %c0_34], %40 {strides = array<i32>} : memref<1x128x128xbf16, #tpu.memory_space<vmem>>, vector<1x128x128xbf16>,
      %41 = tpu.iota {dimensions = array<i32: 0>} : vector<128x1xi32>
      %42 = vector.broadcast %0 : i32 to vector<128x1xi32>
      %43 = arith.addi %42, %41 : vector<128x1xi32>
      %c16_i32 = arith.constant 16 : i32
      %44 = vector.broadcast %c16_i32 : i32 to vector<128x1xi32>
      %45 = arith.cmpi slt, %43, %44 : vector<128x1xi32>
      %46 = arith.extui %45 : vector<128x1xi1> to vector<128x1xi32>
      %47 = arith.sitofp %46 : vector<128x1xi32> to vector<128x1xf32>
      %48 = vector.broadcast %47 : vector<128x1xf32> to vector<128x128xf32>
      %49 = arith.mulf %36, %48 : vector<128x128xf32>
      %cst_35 = arith.constant dense<0.000000e+00> : vector<128xf32>
      %50 = vector.multi_reduction <add>, %49, %cst_35 [0] : vector<128x128xf32> to vector<128xf32>
      %51 = vector.shape_cast %50 : vector<128xf32> to vector<1x128xf32>
      %c0_36 = arith.constant 0 : index
      %c0_37 = arith.constant 0 : index
      %c0_38 = arith.constant 0 : index
      %c0_39 = arith.constant 0 : index
      %52 = vector.load %arg11[%c0_36, %c0_37, %c0_38, %c0_39] : memref<1x1x2x128xf32, #tpu.memory_space<vmem>>, vector<1x1x1x128xf32>
      %53 = vector.shape_cast %52 : vector<1x1x1x128xf32> to vector<1x128xf32>
      %54 = vector.shape_cast %51 : vector<1x128xf32> to vector<1x1x1x128xf32>
      tpu.vector_store %arg11[%c0_36, %c0_37, %c0_38, %c0_39], %54 {strides = array<i32>} : memref<1x1x2x128xf32, #tpu.memory_space<vmem>>, vector<1x1x1x128xf32>,
      %55 = arith.mulf %49, %36 : vector<128x128xf32>
      %cst_40 = arith.constant dense<0.000000e+00> : vector<128xf32>
      %56 = vector.multi_reduction <add>, %55, %cst_40 [0] : vector<128x128xf32> to vector<128xf32>
      %57 = vector.shape_cast %56 : vector<128xf32> to vector<1x128xf32>
      %c0_41 = arith.constant 0 : index
      %c0_42 = arith.constant 0 : index
      %c1 = arith.constant 1 : index
      %c0_43 = arith.constant 0 : index
      %58 = vector.load %arg11[%c0_41, %c0_42, %c1, %c0_43] : memref<1x1x2x128xf32, #tpu.memory_space<vmem>>, vector<1x1x1x128xf32>
      %59 = vector.shape_cast %58 : vector<1x1x1x128xf32> to vector<1x128xf32>
      %60 = vector.shape_cast %57 : vector<1x128xf32> to vector<1x1x1x128xf32>
      tpu.vector_store %arg11[%c0_41, %c0_42, %c1, %c0_43], %60 {strides = array<i32>} : memref<1x1x2x128xf32, #tpu.memory_space<vmem>>, vector<1x1x1x128xf32>,
    } else {
    }
    return
  }
  func.func @transform_0(%arg0: i32, %arg1: i32, %arg2: i32) -> (i32, i32, i32) {
    %c0_i32 = arith.constant 0 : i32
    return %arg0, %arg1, %arg2 : i32, i32, i32
  }
  func.func @transform_1(%arg0: i32, %arg1: i32, %arg2: i32) -> (i32, i32, i32) {
    %c0_i32 = arith.constant 0 : i32
    %c0_i32_0 = arith.constant 0 : i32
    return %arg0, %arg2, %c0_i32 : i32, i32, i32
  }
  func.func @transform_2(%arg0: i32, %arg1: i32, %arg2: i32) -> (i32, i32, i32) {
    %c0_i32 = arith.constant 0 : i32
    %c0_i32_0 = arith.constant 0 : i32
    return %arg0, %arg1, %c0_i32 : i32, i32, i32
  }
  func.func @transform_3(%arg0: i32, %arg1: i32, %arg2: i32) -> (i32, i32) {
    %c0_i32 = arith.constant 0 : i32
    %c0_i32_0 = arith.constant 0 : i32
    %c0_i32_1 = arith.constant 0 : i32
    return %c0_i32, %c0_i32_0 : i32, i32
  }
  func.func @transform_4(%arg0: i32, %arg1: i32, %arg2: i32) -> (i32, i32) {
    %c0_i32 = arith.constant 0 : i32
    %c0_i32_0 = arith.constant 0 : i32
    %c0_i32_1 = arith.constant 0 : i32
    return %c0_i32, %c0_i32_0 : i32, i32
  }
  func.func @transform_5(%arg0: i32, %arg1: i32, %arg2: i32) -> (i32, i32) {
    %c0_i32 = arith.constant 0 : i32
    %c0_i32_0 = arith.constant 0 : i32
    %c0_i32_1 = arith.constant 0 : i32
    return %c0_i32, %c0_i32_0 : i32, i32
  }
  func.func @transform_6(%arg0: i32, %arg1: i32, %arg2: i32) -> (i32, i32) {
    %c0_i32 = arith.constant 0 : i32
    %c0_i32_0 = arith.constant 0 : i32
    %c0_i32_1 = arith.constant 0 : i32
    return %c0_i32, %c0_i32_0 : i32, i32
  }
  func.func @transform_7(%arg0: i32, %arg1: i32, %arg2: i32) -> (i32, i32, i32) {
    %c0_i32 = arith.constant 0 : i32
    %c0_i32_0 = arith.constant 0 : i32
    return %arg0, %arg1, %c0_i32 : i32, i32, i32
  }
  func.func @transform_8(%arg0: i32, %arg1: i32, %arg2: i32) -> (i32, i32, i32, i32) {
    %c0_i32 = arith.constant 0 : i32
    %c0_i32_0 = arith.constant 0 : i32
    %c0_i32_1 = arith.constant 0 : i32
    return %arg0, %arg1, %c0_i32, %c0_i32_0 : i32, i32, i32, i32
  }
}

module attributes {stable_mosaic.version = 11 : i64} {
  func.func @kernel(%arg0: i32, %arg1: i32, %arg2: i32, %arg3: memref<1x128x128xbf16, #tpu.memory_space<vmem>>, %arg4: memref<1x128x128xbf16, #tpu.memory_space<vmem>>, %arg5: memref<1x128x128xbf16, #tpu.memory_space<vmem>>, %arg6: memref<1x128xf32, #tpu.memory_space<vmem>>, %arg7: memref<1x128xf32, #tpu.memory_space<vmem>>, %arg8: memref<256x128xbf16, #tpu.memory_space<vmem>>, %arg9: memref<1x128xf32, #tpu.memory_space<vmem>>, %arg10: memref<1x128x128xbf16, #tpu.memory_space<vmem>>, %arg11: memref<1x1x2x128xf32, #tpu.memory_space<vmem>>, %arg12: memref<128x128xf32, #tpu.memory_space<vmem>>, %arg13: memref<128x1xf32, #tpu.memory_space<vmem>>, %arg14: memref<128x256xbf16, #tpu.memory_space<vmem>>) attributes {dimension_semantics = [#tpu.dimension_semantics<parallel>, #tpu.dimension_semantics<parallel>, #tpu.dimension_semantics<arbitrary>], iteration_bounds = array<i64: 2, 1, 1>, scalar_prefetch = 0 : i64, scratch_operands = 3 : i64, tpu.core_type = #tpu.core_type<tc>, window_params = [{transform_indices = @transform_0, window_bounds = array<i64: 1, 128, 128>}, {transform_indices = @transform_1, window_bounds = array<i64: 1, 128, 128>}, {transform_indices = @transform_2, window_bounds = array<i64: 1, 128, 128>}, {pipeline_mode = #tpu.pipeline_mode<synchronous>, transform_indices = @transform_3, window_bounds = array<i64: 1, 128>}, {pipeline_mode = #tpu.pipeline_mode<synchronous>, transform_indices = @transform_4, window_bounds = array<i64: 1, 128>}, {pipeline_mode = #tpu.pipeline_mode<synchronous>, transform_indices = @transform_5, window_bounds = array<i64: 256, 128>}, {pipeline_mode = #tpu.pipeline_mode<synchronous>, transform_indices = @transform_6, window_bounds = array<i64: 1, 128>}, {transform_indices = @transform_7, window_bounds = array<i64: 1, 128, 128>}, {transform_indices = @transform_8, window_bounds = array<i64: 1, 1, 2, 128>}]} {
    %c128_i32 = arith.constant 128 : i32
    %0 = arith.muli %arg1, %c128_i32 : i32
    %c0 = arith.constant 0 : index
    %c0_0 = arith.constant 0 : index
    %c0_1 = arith.constant 0 : index
    %1 = vector.load %arg3[%c0, %c0_0, %c0_1] : memref<1x128x128xbf16, #tpu.memory_space<vmem>>, vector<1x128x128xbf16>
    %2 = vector.shape_cast %1 : vector<1x128x128xbf16> to vector<128x128xbf16>
    %c0_2 = arith.constant 0 : index
    %c0_3 = arith.constant 0 : index
    %c0_4 = arith.constant 0 : index
    %3 = vector.load %arg4[%c0_2, %c0_3, %c0_4] : memref<1x128x128xbf16, #tpu.memory_space<vmem>>, vector<1x128x128xbf16>
    %4 = vector.shape_cast %3 : vector<1x128x128xbf16> to vector<128x128xbf16>
    %5 = arith.extf %4 : vector<128x128xbf16> to vector<128x128xf32>
    %c0_5 = arith.constant 0 : index
    %c0_6 = arith.constant 0 : index
    %6 = vector.load %arg6[%c0_5, %c0_6] : memref<1x128xf32, #tpu.memory_space<vmem>>, vector<1x128xf32>
    %7 = vector.broadcast %6 : vector<1x128xf32> to vector<128x128xf32>
    %8 = arith.mulf %5, %7 : vector<128x128xf32>
    %c0_7 = arith.constant 0 : index
    %c0_8 = arith.constant 0 : index
    %9 = vector.load %arg7[%c0_7, %c0_8] : memref<1x128xf32, #tpu.memory_space<vmem>>, vector<1x128xf32>
    %10 = vector.broadcast %9 : vector<1x128xf32> to vector<128x128xf32>
    %11 = arith.addf %8, %10 : vector<128x128xf32>
    %cst = arith.constant 0.000000e+00 : f32
    %12 = vector.broadcast %cst : f32 to vector<128x128xf32>
    %13 = arith.maximumf %11, %12 : vector<128x128xf32>
    %14 = arith.truncf %13 : vector<128x128xf32> to vector<128x128xbf16>
    %c0_i32 = arith.constant 0 : i32
    %15 = arith.cmpi eq, %arg2, %c0_i32 : i32
    %16 = arith.extui %15 : i1 to i32
    %c0_i32_9 = arith.constant 0 : i32
    %17 = arith.cmpi ne, %16, %c0_i32_9 : i32
    scf.if %17 {
      %cst_22 = arith.constant 0.000000e+00 : f32
      %31 = vector.broadcast %cst_22 : f32 to vector<128x128xf32>
      %c0_23 = arith.constant 0 : index
      %c0_24 = arith.constant 0 : index
      %32 = vector.load %arg12[%c0_23, %c0_24] : memref<128x128xf32, #tpu.memory_space<vmem>>, vector<128x128xf32>
      tpu.vector_store %arg12[%c0_23, %c0_24], %31 {strides = array<i32>} : memref<128x128xf32, #tpu.memory_space<vmem>>, vector<128x128xf32>,
      %cst_25 = arith.constant 0.000000e+00 : f32
      %33 = vector.broadcast %cst_25 : f32 to vector<128x1xf32>
      %c0_26 = arith.constant 0 : index
      %c0_27 = arith.constant 0 : index
      %34 = vector.load %arg13[%c0_26, %c0_27] : memref<128x1xf32, #tpu.memory_space<vmem>>, vector<128x1xf32>
      tpu.vector_store %arg13[%c0_26, %c0_27], %33 {strides = array<i32>} : memref<128x1xf32, #tpu.memory_space<vmem>>, vector<128x1xf32>,
      %c0_28 = arith.constant 0 : index
      %c0_29 = arith.constant 0 : index
      %c0_30 = arith.constant 0 : index
      %35 = vector.load %arg5[%c0_28, %c0_29, %c0_30] : memref<1x128x128xbf16, #tpu.memory_space<vmem>>, vector<1x128x128xbf16>
      %36 = vector.shape_cast %35 : vector<1x128x128xbf16> to vector<128x128xbf16>
      %37 = arith.extf %36 : vector<128x128xbf16> to vector<128x128xf32>
      %c0_31 = arith.constant 0 : index
      %c0_32 = arith.constant 0 : index
      %38 = vector.load %arg6[%c0_31, %c0_32] : memref<1x128xf32, #tpu.memory_space<vmem>>, vector<1x128xf32>
      %39 = vector.broadcast %38 : vector<1x128xf32> to vector<128x128xf32>
      %40 = arith.mulf %37, %39 : vector<128x128xf32>
      %c0_33 = arith.constant 0 : index
      %c0_34 = arith.constant 0 : index
      %41 = vector.load %arg7[%c0_33, %c0_34] : memref<1x128xf32, #tpu.memory_space<vmem>>, vector<1x128xf32>
      %42 = vector.broadcast %41 : vector<1x128xf32> to vector<128x128xf32>
      %43 = arith.addf %40, %42 : vector<128x128xf32>
      %cst_35 = arith.constant 0.000000e+00 : f32
      %44 = vector.broadcast %cst_35 : f32 to vector<128x128xf32>
      %45 = arith.maximumf %43, %44 : vector<128x128xf32>
      %46 = arith.truncf %45 : vector<128x128xf32> to vector<128x128xbf16>
      %c0_36 = arith.constant 0 : index
      %c128 = arith.constant 128 : index
      %47 = vector.load %arg14[%c0_36, %c128] : memref<128x256xbf16, #tpu.memory_space<vmem>>, vector<128x128xbf16>
      tpu.vector_store %arg14[%c0_36, %c128], %46 {strides = array<i32>} : memref<128x256xbf16, #tpu.memory_space<vmem>>, vector<128x128xbf16>,
    } else {
    }
    %c0_10 = arith.constant 0 : index
    %c0_11 = arith.constant 0 : index
    %18 = vector.load %arg12[%c0_10, %c0_11] : memref<128x128xf32, #tpu.memory_space<vmem>>, vector<128x128xf32>
    %cst_12 = arith.constant dense<0.000000e+00> : vector<128x128xf32>
    %19 = tpu.matmul %2, %14, %cst_12 {dimension_numbers = #tpu.dot_dimension_numbers<[1], [0], [0], [1], [0, 0, 1, 1], [], []>} : vector<128x128xbf16>, vector<128x128xbf16>, vector<128x128xf32> -> vector<128x128xf32>
    %20 = arith.addf %18, %19 : vector<128x128xf32>
    %c0_13 = arith.constant 0 : index
    %c0_14 = arith.constant 0 : index
    %21 = vector.load %arg12[%c0_13, %c0_14] : memref<128x128xf32, #tpu.memory_space<vmem>>, vector<128x128xf32>
    tpu.vector_store %arg12[%c0_13, %c0_14], %20 {strides = array<i32>} : memref<128x128xf32, #tpu.memory_space<vmem>>, vector<128x128xf32>,
    %c0_15 = arith.constant 0 : index
    %c0_16 = arith.constant 0 : index
    %22 = vector.load %arg13[%c0_15, %c0_16] : memref<128x1xf32, #tpu.memory_space<vmem>>, vector<128x1xf32>
    %23 = arith.extf %2 : vector<128x128xbf16> to vector<128x128xf32>
    %cst_17 = arith.constant dense<0.000000e+00> : vector<128xf32>
    %24 = vector.multi_reduction <add>, %23, %cst_17 [1] : vector<128x128xf32> to vector<128xf32>
    %25 = vector.shape_cast %24 : vector<128xf32> to vector<128x1xf32>
    %26 = arith.addf %22, %25 : vector<128x1xf32>
    %c0_18 = arith.constant 0 : index
    %c0_19 = arith.constant 0 : index
    %27 = vector.load %arg13[%c0_18, %c0_19] : memref<128x1xf32, #tpu.memory_space<vmem>>, vector<128x1xf32>
    tpu.vector_store %arg13[%c0_18, %c0_19], %26 {strides = array<i32>} : memref<128x1xf32, #tpu.memory_space<vmem>>, vector<128x1xf32>,
    %c0_i32_20 = arith.constant 0 : i32
    %28 = arith.cmpi eq, %arg2, %c0_i32_20 : i32
    %29 = arith.extui %28 : i1 to i32
    %c0_i32_21 = arith.constant 0 : i32
    %30 = arith.cmpi ne, %29, %c0_i32_21 : i32
    scf.if %30 {
      %c0_22 = arith.constant 0 : index
      %c0_23 = arith.constant 0 : index
      %31 = vector.load %arg13[%c0_22, %c0_23] : memref<128x1xf32, #tpu.memory_space<vmem>>, vector<128x1xf32>
      %cst_24 = arith.constant 1.000000e+00 : f32
      %32 = vector.broadcast %cst_24 : f32 to vector<128x1xf32>
      %33 = arith.maximumf %31, %32 : vector<128x1xf32>
      %cst_25 = arith.constant 1.000000e+00 : f32
      %34 = vector.broadcast %cst_25 : f32 to vector<128x1xf32>
      %35 = arith.divf %34, %33 : vector<128x1xf32>
      %c0_26 = arith.constant 0 : index
      %c0_27 = arith.constant 0 : index
      %36 = vector.load %arg12[%c0_26, %c0_27] : memref<128x128xf32, #tpu.memory_space<vmem>>, vector<128x128xf32>
      %37 = vector.broadcast %35 : vector<128x1xf32> to vector<128x128xf32>
      %38 = arith.mulf %36, %37 : vector<128x128xf32>
      %39 = arith.truncf %38 : vector<128x128xf32> to vector<128x128xbf16>
      %c0_28 = arith.constant 0 : index
      %c0_29 = arith.constant 0 : index
      %40 = vector.load %arg14[%c0_28, %c0_29] : memref<128x256xbf16, #tpu.memory_space<vmem>>, vector<128x128xbf16>
      tpu.vector_store %arg14[%c0_28, %c0_29], %39 {strides = array<i32>} : memref<128x256xbf16, #tpu.memory_space<vmem>>, vector<128x128xbf16>,
      %c0_30 = arith.constant 0 : index
      %c0_31 = arith.constant 0 : index
      %41 = vector.load %arg14[%c0_30, %c0_31] : memref<128x256xbf16, #tpu.memory_space<vmem>>, vector<128x256xbf16>
      %c0_32 = arith.constant 0 : index
      %c0_33 = arith.constant 0 : index
      %42 = vector.load %arg8[%c0_32, %c0_33] : memref<256x128xbf16, #tpu.memory_space<vmem>>, vector<256x128xbf16>
      %cst_34 = arith.constant dense<0.000000e+00> : vector<128x128xf32>
      %43 = tpu.matmul %41, %42, %cst_34 {dimension_numbers = #tpu.dot_dimension_numbers<[1], [0], [0], [1], [0, 0, 1, 1], [], []>} : vector<128x256xbf16>, vector<256x128xbf16>, vector<128x128xf32> -> vector<128x128xf32>
      %c0_35 = arith.constant 0 : index
      %c0_36 = arith.constant 0 : index
      %44 = vector.load %arg9[%c0_35, %c0_36] : memref<1x128xf32, #tpu.memory_space<vmem>>, vector<1x128xf32>
      %45 = vector.broadcast %44 : vector<1x128xf32> to vector<128x128xf32>
      %46 = arith.addf %43, %45 : vector<128x128xf32>
      %47 = arith.truncf %46 : vector<128x128xf32> to vector<128x128xbf16>
      %c0_37 = arith.constant 0 : index
      %c0_38 = arith.constant 0 : index
      %c0_39 = arith.constant 0 : index
      %48 = vector.load %arg10[%c0_37, %c0_38, %c0_39] : memref<1x128x128xbf16, #tpu.memory_space<vmem>>, vector<1x128x128xbf16>
      %49 = vector.shape_cast %48 : vector<1x128x128xbf16> to vector<128x128xbf16>
      %50 = vector.shape_cast %47 : vector<128x128xbf16> to vector<1x128x128xbf16>
      tpu.vector_store %arg10[%c0_37, %c0_38, %c0_39], %50 {strides = array<i32>} : memref<1x128x128xbf16, #tpu.memory_space<vmem>>, vector<1x128x128xbf16>,
      %51 = tpu.iota {dimensions = array<i32: 0>} : vector<128x1xi32>
      %52 = vector.broadcast %0 : i32 to vector<128x1xi32>
      %53 = arith.addi %52, %51 : vector<128x1xi32>
      %c16_i32 = arith.constant 16 : i32
      %54 = vector.broadcast %c16_i32 : i32 to vector<128x1xi32>
      %55 = arith.cmpi slt, %53, %54 : vector<128x1xi32>
      %56 = arith.extui %55 : vector<128x1xi1> to vector<128x1xi32>
      %57 = arith.sitofp %56 : vector<128x1xi32> to vector<128x1xf32>
      %58 = vector.broadcast %57 : vector<128x1xf32> to vector<128x128xf32>
      %59 = arith.mulf %46, %58 : vector<128x128xf32>
      %cst_40 = arith.constant dense<0.000000e+00> : vector<128xf32>
      %60 = vector.multi_reduction <add>, %59, %cst_40 [0] : vector<128x128xf32> to vector<128xf32>
      %61 = vector.shape_cast %60 : vector<128xf32> to vector<1x128xf32>
      %c0_41 = arith.constant 0 : index
      %c0_42 = arith.constant 0 : index
      %c0_43 = arith.constant 0 : index
      %c0_44 = arith.constant 0 : index
      %62 = vector.load %arg11[%c0_41, %c0_42, %c0_43, %c0_44] : memref<1x1x2x128xf32, #tpu.memory_space<vmem>>, vector<1x1x1x128xf32>
      %63 = vector.shape_cast %62 : vector<1x1x1x128xf32> to vector<1x128xf32>
      %64 = vector.shape_cast %61 : vector<1x128xf32> to vector<1x1x1x128xf32>
      tpu.vector_store %arg11[%c0_41, %c0_42, %c0_43, %c0_44], %64 {strides = array<i32>} : memref<1x1x2x128xf32, #tpu.memory_space<vmem>>, vector<1x1x1x128xf32>,
      %65 = arith.mulf %59, %46 : vector<128x128xf32>
      %cst_45 = arith.constant dense<0.000000e+00> : vector<128xf32>
      %66 = vector.multi_reduction <add>, %65, %cst_45 [0] : vector<128x128xf32> to vector<128xf32>
      %67 = vector.shape_cast %66 : vector<128xf32> to vector<1x128xf32>
      %c0_46 = arith.constant 0 : index
      %c0_47 = arith.constant 0 : index
      %c1 = arith.constant 1 : index
      %c0_48 = arith.constant 0 : index
      %68 = vector.load %arg11[%c0_46, %c0_47, %c1, %c0_48] : memref<1x1x2x128xf32, #tpu.memory_space<vmem>>, vector<1x1x1x128xf32>
      %69 = vector.shape_cast %68 : vector<1x1x1x128xf32> to vector<1x128xf32>
      %70 = vector.shape_cast %67 : vector<1x128xf32> to vector<1x1x1x128xf32>
      tpu.vector_store %arg11[%c0_46, %c0_47, %c1, %c0_48], %70 {strides = array<i32>} : memref<1x1x2x128xf32, #tpu.memory_space<vmem>>, vector<1x1x1x128xf32>,
    } else {
    }
    return
  }
  func.func @transform_0(%arg0: i32, %arg1: i32, %arg2: i32) -> (i32, i32, i32) {
    %c0_i32 = arith.constant 0 : i32
    return %arg0, %arg1, %arg2 : i32, i32, i32
  }
  func.func @transform_1(%arg0: i32, %arg1: i32, %arg2: i32) -> (i32, i32, i32) {
    %c0_i32 = arith.constant 0 : i32
    %c0_i32_0 = arith.constant 0 : i32
    return %arg0, %arg2, %c0_i32 : i32, i32, i32
  }
  func.func @transform_2(%arg0: i32, %arg1: i32, %arg2: i32) -> (i32, i32, i32) {
    %c0_i32 = arith.constant 0 : i32
    %c0_i32_0 = arith.constant 0 : i32
    return %arg0, %arg1, %c0_i32 : i32, i32, i32
  }
  func.func @transform_3(%arg0: i32, %arg1: i32, %arg2: i32) -> (i32, i32) {
    %c0_i32 = arith.constant 0 : i32
    %c0_i32_0 = arith.constant 0 : i32
    %c0_i32_1 = arith.constant 0 : i32
    return %c0_i32, %c0_i32_0 : i32, i32
  }
  func.func @transform_4(%arg0: i32, %arg1: i32, %arg2: i32) -> (i32, i32) {
    %c0_i32 = arith.constant 0 : i32
    %c0_i32_0 = arith.constant 0 : i32
    %c0_i32_1 = arith.constant 0 : i32
    return %c0_i32, %c0_i32_0 : i32, i32
  }
  func.func @transform_5(%arg0: i32, %arg1: i32, %arg2: i32) -> (i32, i32) {
    %c0_i32 = arith.constant 0 : i32
    %c0_i32_0 = arith.constant 0 : i32
    %c0_i32_1 = arith.constant 0 : i32
    return %c0_i32, %c0_i32_0 : i32, i32
  }
  func.func @transform_6(%arg0: i32, %arg1: i32, %arg2: i32) -> (i32, i32) {
    %c0_i32 = arith.constant 0 : i32
    %c0_i32_0 = arith.constant 0 : i32
    %c0_i32_1 = arith.constant 0 : i32
    return %c0_i32, %c0_i32_0 : i32, i32
  }
  func.func @transform_7(%arg0: i32, %arg1: i32, %arg2: i32) -> (i32, i32, i32) {
    %c0_i32 = arith.constant 0 : i32
    %c0_i32_0 = arith.constant 0 : i32
    return %arg0, %arg1, %c0_i32 : i32, i32, i32
  }
  func.func @transform_8(%arg0: i32, %arg1: i32, %arg2: i32) -> (i32, i32, i32, i32) {
    %c0_i32 = arith.constant 0 : i32
    %c0_i32_0 = arith.constant 0 : i32
    %c0_i32_1 = arith.constant 0 : i32
    return %arg0, %arg1, %c0_i32, %c0_i32_0 : i32, i32, i32, i32
  }
}

module attributes {stable_mosaic.version = 11 : i64} {
  func.func @_bn_relu_kernel(%arg0: i32, %arg1: i32, %arg2: memref<1x128x128xbf16, #tpu.memory_space<vmem>>, %arg3: memref<1x128xf32, #tpu.memory_space<vmem>>, %arg4: memref<1x128xf32, #tpu.memory_space<vmem>>, %arg5: memref<1x128x128xf32, #tpu.memory_space<vmem>>) attributes {dimension_semantics = [#tpu.dimension_semantics<parallel>, #tpu.dimension_semantics<parallel>], iteration_bounds = array<i64: 2, 1>, scalar_prefetch = 0 : i64, scratch_operands = 0 : i64, tpu.core_type = #tpu.core_type<tc>, window_params = [{transform_indices = @transform_0, window_bounds = array<i64: 1, 128, 128>}, {pipeline_mode = #tpu.pipeline_mode<synchronous>, transform_indices = @transform_1, window_bounds = array<i64: 1, 128>}, {pipeline_mode = #tpu.pipeline_mode<synchronous>, transform_indices = @transform_2, window_bounds = array<i64: 1, 128>}, {transform_indices = @transform_3, window_bounds = array<i64: 1, 128, 128>}]} {
    %c0 = arith.constant 0 : index
    %c0_0 = arith.constant 0 : index
    %c0_1 = arith.constant 0 : index
    %0 = vector.load %arg2[%c0, %c0_0, %c0_1] : memref<1x128x128xbf16, #tpu.memory_space<vmem>>, vector<1x128x128xbf16>
    %1 = vector.shape_cast %0 : vector<1x128x128xbf16> to vector<128x128xbf16>
    %2 = arith.extf %1 : vector<128x128xbf16> to vector<128x128xf32>
    %c0_2 = arith.constant 0 : index
    %c0_3 = arith.constant 0 : index
    %3 = vector.load %arg3[%c0_2, %c0_3] : memref<1x128xf32, #tpu.memory_space<vmem>>, vector<1x128xf32>
    %4 = vector.broadcast %3 : vector<1x128xf32> to vector<128x128xf32>
    %5 = arith.mulf %2, %4 : vector<128x128xf32>
    %c0_4 = arith.constant 0 : index
    %c0_5 = arith.constant 0 : index
    %6 = vector.load %arg4[%c0_4, %c0_5] : memref<1x128xf32, #tpu.memory_space<vmem>>, vector<1x128xf32>
    %7 = vector.broadcast %6 : vector<1x128xf32> to vector<128x128xf32>
    %8 = arith.addf %5, %7 : vector<128x128xf32>
    %cst = arith.constant 0.000000e+00 : f32
    %9 = vector.broadcast %cst : f32 to vector<128x128xf32>
    %10 = arith.maximumf %8, %9 : vector<128x128xf32>
    %c0_6 = arith.constant 0 : index
    %c0_7 = arith.constant 0 : index
    %c0_8 = arith.constant 0 : index
    %11 = vector.load %arg5[%c0_6, %c0_7, %c0_8] : memref<1x128x128xf32, #tpu.memory_space<vmem>>, vector<1x128x128xf32>
    %12 = vector.shape_cast %11 : vector<1x128x128xf32> to vector<128x128xf32>
    %13 = vector.shape_cast %10 : vector<128x128xf32> to vector<1x128x128xf32>
    tpu.vector_store %arg5[%c0_6, %c0_7, %c0_8], %13 {strides = array<i32>} : memref<1x128x128xf32, #tpu.memory_space<vmem>>, vector<1x128x128xf32>,
    return
  }
  func.func @transform_0(%arg0: i32, %arg1: i32) -> (i32, i32, i32) {
    %c0_i32 = arith.constant 0 : i32
    %c0_i32_0 = arith.constant 0 : i32
    return %arg0, %arg1, %c0_i32 : i32, i32, i32
  }
  func.func @transform_1(%arg0: i32, %arg1: i32) -> (i32, i32) {
    %c0_i32 = arith.constant 0 : i32
    %c0_i32_0 = arith.constant 0 : i32
    %c0_i32_1 = arith.constant 0 : i32
    return %c0_i32, %c0_i32_0 : i32, i32
  }
  func.func @transform_2(%arg0: i32, %arg1: i32) -> (i32, i32) {
    %c0_i32 = arith.constant 0 : i32
    %c0_i32_0 = arith.constant 0 : i32
    %c0_i32_1 = arith.constant 0 : i32
    return %c0_i32, %c0_i32_0 : i32, i32
  }
  func.func @transform_3(%arg0: i32, %arg1: i32) -> (i32, i32, i32) {
    %c0_i32 = arith.constant 0 : i32
    %c0_i32_0 = arith.constant 0 : i32
    return %arg0, %arg1, %c0_i32 : i32, i32, i32
  }
}

</mosaic_0001>

<bundles_post_ra>
// kernel: gnn_forward.7
= control target key start
LH: loop header
LB: loop body
LE: loop exit
PB: predicated region body
PF: predicated region fallthrough
CT: control target
= control target key end

     0   :  { %s529_s12 = smov 0   ;;  %s531_s13 = smov 0   ;;  %s636_s0 = inlined_call_operand.vmem [shape: bf16[2,128,128], index: 0, kind: input, shape index: {}]   ;;  %s637_s1 = inlined_call_operand.vmem [shape: f32[1,128], index: 1, kind: input, shape index: {}]   ;;  %s638_s2 = inlined_call_operand.vmem [shape: f32[1,128], index: 2, kind: input, shape index: {}]   ;;  %s639_s3 = inlined_call_operand.vmem [shape: f32[2,128,128], index: 3, kind: output, shape index: {}]  }
   0x1   :  { %s533_s14 = smov 0  }
   0x2 LB: > { %s25_s15 = sadd.s32 1, %s503_s13  ;;  %p411_p0 = scmp.ge.s32.totalorder %s507_s14, 1  ;;  %s507_s14 = sphi %s533_s14, %s13_s14   ;;  %s503_s13 = sphi %s531_s13, %s641_s13   ;;  %s499_s12 = sphi %s529_s12, %s640_s12  }
   0x3   : > { %p27_p1 = scmp.ge.s32.totalorder %s25_s15, 2  ;;  %p158_p2 = scmp.lt.s32.totalorder %s507_s14, 3 }
   0x5   : > { %s643_s15 = smov (%p27_p1, %s25_s15), 0  ;;  %p159_p3 = pnand %p411_p0, %p158_p2 }
   0x6   : > { %p191_p4 = scmp.lt.s32.totalorder (!%p159_p3), %s499_s12, 1 }
   0x7   : > { %162 = sbr.rel (%p159_p3) target bundleno = 36 (0x24), region = 32 }
   0xc   : > { %s645_s12 = smov (!%p191_p4, %s499_s12), 1  ;;  %v558_v0 = vld [vmem:[%s637_s1] ss:$0 sm:$0xff] }
   0xd   : > { %s420_s16 = sshll.u32 %s645_s12, 6  ;;  %v567_v9 = vld [vmem:[%s638_s2] ss:$0 sm:$0xff]  ;;  %s421_s24 = sshll.u32 %s645_s12, 7 }
   0xe   : > { %s553_s19 = scalar_lea.vmem %s636_s0, %s420_s16  ;;  %s585_s27 = scalar_lea.vmem %s639_s3, %s421_s24 }
   0xf   : > { %v423_v1 = vld [vmem:[%s553_s19] sm:$0xff]   ;;  %v454_v2 = vld [vmem:[%s553_s19 + $0x8] sm:$0xff]   ;;  %v455_v3 = vld [vmem:[%s553_s19 + $0x10] sm:$0xff]  }
  0x10   : > { %v424_v4 = vunpack.c.l.bf16 %v423_v1  ;;  %v425_v5 = vunpack.c.h.bf16 %v423_v1  ;;  %v428_v6 = vunpack.c.l.bf16 %v454_v2  ;;  %v429_v7 = vunpack.c.h.bf16 %v454_v2  ;;  %v456_v8 = vld [vmem:[%s553_s19 + $0x18] sm:$0xff]   ;;  %v457_v30 = vld [vmem:[%s553_s19 + $0x20] sm:$0xff]   ;;  %v458_v31 = vld [vmem:[%s553_s19 + $0x28] sm:$0xff]  }
  0x11   : > { %v432_v10 = vunpack.c.l.bf16 %v455_v3  ;;  %v433_v11 = vunpack.c.h.bf16 %v455_v3  ;;  %v436_v12 = vunpack.c.l.bf16 %v456_v8  ;;  %v437_v13 = vunpack.c.h.bf16 %v456_v8  ;;  %v459_v36 = vld [vmem:[%s553_s19 + $0x30] sm:$0xff]   ;;  %v460_v37 = vld [vmem:[%s553_s19 + $0x38] sm:$0xff]  }
  0x12   : > { %v249_v14 = vmul.f32 %v424_v4, %v558_v0  ;;  %v250_v15 = vmul.f32 %v425_v5, %v558_v0  ;;  %v251_v16 = vmul.f32 %v428_v6, %v558_v0  ;;  %v252_v17 = vmul.f32 %v429_v7, %v558_v0 }
  0x13   : > { %v253_v18 = vmul.f32 %v432_v10, %v558_v0  ;;  %v254_v19 = vmul.f32 %v433_v11, %v558_v0  ;;  %v255_v20 = vmul.f32 %v436_v12, %v558_v0  ;;  %v256_v21 = vmul.f32 %v437_v13, %v558_v0 }
  0x14   : > { %v272_v22 = vadd.f32 %v567_v9, %v249_v14  ;;  %v273_v23 = vadd.f32 %v567_v9, %v250_v15  ;;  %v274_v24 = vadd.f32 %v567_v9, %v251_v16  ;;  %v275_v25 = vadd.f32 %v567_v9, %v252_v17 }
  0x15   : > { %v276_v26 = vadd.f32 %v567_v9, %v253_v18  ;;  %v277_v27 = vadd.f32 %v567_v9, %v254_v19  ;;  %v278_v28 = vadd.f32 %v567_v9, %v255_v20  ;;  %v279_v29 = vadd.f32 %v567_v9, %v256_v21 }
  0x16   : > { %v288_v32 = vmax.f32 %v272_v22, 0.0  ;;  %v289_v33 = vmax.f32 %v273_v23, 0.0  ;;  %v290_v34 = vmax.f32 %v274_v24, 0.0  ;;  %v291_v35 = vmax.f32 %v275_v25, 0.0 }
  0x17   : > { %v292_v38 = vmax.f32 %v276_v26, 0.0  ;;  %v293_v39 = vmax.f32 %v277_v27, 0.0  ;;  %v294_v40 = vmax.f32 %v278_v28, 0.0  ;;  %v295_v41 = vmax.f32 %v279_v29, 0.0 }
  0x18   : > { %304 = vst [vmem:[%s585_s27] sm:$0xff] %v288_v32  ;;  %305 = vst [vmem:[%s585_s27 + $0x8] sm:$0xff] %v289_v33  ;;  %v440_v42 = vunpack.c.l.bf16 %v457_v30  ;;  %v441_v43 = vunpack.c.h.bf16 %v457_v30  ;;  %v444_v44 = vunpack.c.l.bf16 %v458_v31  ;;  %v445_v45 = vunpack.c.h.bf16 %v458_v31 }
  0x19   : > { %306 = vst [vmem:[%s585_s27 + $0x10] sm:$0xff] %v290_v34  ;;  %307 = vst [vmem:[%s585_s27 + $0x18] sm:$0xff] %v291_v35  ;;  %v448_v46 = vunpack.c.l.bf16 %v459_v36  ;;  %v449_v47 = vunpack.c.h.bf16 %v459_v36  ;;  %v452_v48 = vunpack.c.l.bf16 %v460_v37  ;;  %v453_v49 = vunpack.c.h.bf16 %v460_v37 }
  0x1a   : > { %308 = vst [vmem:[%s585_s27 + $0x20] sm:$0xff] %v292_v38  ;;  %309 = vst [vmem:[%s585_s27 + $0x28] sm:$0xff] %v293_v39  ;;  %v257_v50 = vmul.f32 %v440_v42, %v558_v0  ;;  %v258_v51 = vmul.f32 %v441_v43, %v558_v0  ;;  %v259_v52 = vmul.f32 %v444_v44, %v558_v0 }
  0x1b   : > { %310 = vst [vmem:[%s585_s27 + $0x30] sm:$0xff] %v294_v40  ;;  %311 = vst [vmem:[%s585_s27 + $0x38] sm:$0xff] %v295_v41  ;;  %v260_v53 = vmul.f32 %v445_v45, %v558_v0  ;;  %v261_v54 = vmul.f32 %v448_v46, %v558_v0  ;;  %v262_v55 = vmul.f32 %v449_v47, %v558_v0 }
  0x1c   : > { %v263_v56 = vmul.f32 %v452_v48, %v558_v0  ;;  %v264_v57 = vmul.f32 %v453_v49, %v558_v0  ;;  %v280_v58 = vadd.f32 %v567_v9, %v257_v50  ;;  %v281_v59 = vadd.f32 %v567_v9, %v258_v51 }
  0x1d   : > { %v282_v60 = vadd.f32 %v567_v9, %v259_v52  ;;  %v283_v61 = vadd.f32 %v567_v9, %v260_v53  ;;  %v284_v62 = vadd.f32 %v567_v9, %v261_v54  ;;  %v285_v63 = vadd.f32 %v567_v9, %v262_v55 }
  0x1e   : > { %v286_v0 = vadd.f32 %v567_v9, %v263_v56  ;;  %v287_v1 = vadd.f32 %v567_v9, %v264_v57  ;;  %v296_v2 = vmax.f32 %v280_v58, 0.0  ;;  %v297_v3 = vmax.f32 %v281_v59, 0.0 }
  0x1f   : > { %v298_v4 = vmax.f32 %v282_v60, 0.0  ;;  %v299_v5 = vmax.f32 %v283_v61, 0.0  ;;  %v300_v6 = vmax.f32 %v284_v62, 0.0  ;;  %v301_v7 = vmax.f32 %v285_v63, 0.0 }
  0x20   : > { %v302_v8 = vmax.f32 %v286_v0, 0.0  ;;  %v303_v10 = vmax.f32 %v287_v1, 0.0  ;;  %312 = vst [vmem:[%s585_s27 + $0x40] sm:$0xff] %v296_v2  ;;  %313 = vst [vmem:[%s585_s27 + $0x48] sm:$0xff] %v297_v3 }
  0x21   : > { %314 = vst [vmem:[%s585_s27 + $0x50] sm:$0xff] %v298_v4  ;;  %315 = vst [vmem:[%s585_s27 + $0x58] sm:$0xff] %v299_v5 }
  0x22   : > { %316 = vst [vmem:[%s585_s27 + $0x60] sm:$0xff] %v300_v6  ;;  %317 = vst [vmem:[%s585_s27 + $0x68] sm:$0xff] %v301_v7 }
  0x23   : > { %318 = vst [vmem:[%s585_s27 + $0x70] sm:$0xff] %v302_v8  ;;  %319 = vst [vmem:[%s585_s27 + $0x78] sm:$0xff] %v303_v10 }
  0x24 PF: > { %s13_s14 = sadd.s32 1, %s507_s14   ;;  %s640_s12 = smov %s503_s13 }
  0x25   : > { %p10_p5 = scmp.ge.s32.totalorder %s13_s14, 4   ;;  %s641_s13 = smov %s643_s15 }
  0x27   :  { %12 = sbr.rel (!%p10_p5) target bundleno = 2 (0x2), region = 62 }

// kernel: gnn_forward.4
= control target key start
LH: loop header
LB: loop body
LE: loop exit
PB: predicated region body
PF: predicated region fallthrough
CT: control target
= control target key end

     0   :  { %s2393_s27 = smov 0   ;;  %s2395_s28 = smov 0   ;;  %s2622_s0 = inlined_call_operand.vmem [shape: bf16[2,128,128], index: 0, kind: input, shape index: {}]   ;;  %s2623_s1 = inlined_call_operand.vmem [shape: bf16[2,128,128], index: 1, kind: input, shape index: {}, may-alias: {1,2}]   ;;  %s2624_s2 = inlined_call_operand.vmem [shape: bf16[2,128,128], index: 2, kind: input, shape index: {}, may-alias: {1,2}]   ;;  %s2625_s3 = inlined_call_operand.vmem [shape: f32[1,128], index: 3, kind: input, shape index: {}]   ;;  %s2626_s4 = inlined_call_operand.vmem [shape: f32[1,128], index: 4, kind: input, shape index: {}]   ;;  %s2627_s5 = inlined_call_operand.vmem [shape: bf16[256,128], index: 5, kind: input, shape index: {}]   ;;  %s2628_s6 = inlined_call_operand.vmem [shape: f32[1,128], index: 6, kind: input, shape index: {}]   ;;  %s2629_s7 = inlined_call_operand.vmem [shape: bf16[2,128,128], index: 7, kind: output, shape index: {0}]   ;;  %s2630_s8 = inlined_call_operand.vmem [shape: f32[2,1,2,128], index: 8, kind: output, shape index: {1}]  }
   0x1   :  { %s2397_s3 = smov 0  }
   0x2 LB: > { %s38_s4 = sadd.s32 1, %s2340_s28  ;;  %p1894_p0 = scmp.ge.s32.totalorder %s2344_s3, 1  ;;  %s2344_s3 = sphi %s2397_s3, %s19_s3   ;;  %s2340_s28 = sphi %s2395_s28, %s2632_s28   ;;  %s2336_s27 = sphi %s2393_s27, %s2631_s27  }
   0x3   : > { %p40_p1 = scmp.ge.s32.totalorder %s38_s4, 2  ;;  %p334_p2 = scmp.lt.s32.totalorder %s2344_s3, 3 }
   0x5   : > { %s2634_s4 = smov (%p40_p1, %s38_s4), 0  ;;  %p335_p3 = pnand %p1894_p0, %p334_p2 }
   0x6   : > { %p405_p4 = scmp.lt.s32.totalorder (!%p335_p3), %s2336_s27, 1 }
   0x7   : > { %338 = sbr.rel (%p335_p3) target bundleno = 596 (0x254), region = 48 }
   0xc   : > { %vm508_vm0 = vcmask 7168   ;;  %v2346_v0 = vmov 0.0   ;;  %s2636_s27 = smov (!%p405_p4, %s2336_s27), 1  ;;  %v2347_v33 = vmov 0   ;;  %v2242_v34 = vld [vmem:[%s2627_s5 + $0x78] sm:$0xff]   ;;  %v2244_v36 = vld [vmem:[%s2627_s5 + $0x70] sm:$0xff]  }
   0xd   : > { %513 = vst.msk [vmem:[#allocation3 + $0x20] sm:$0xff] %vm508_vm0, %v2346_v0  ;;  %509 = vst.msk [vmem:[#allocation3] sm:$0xff] %vm508_vm0, %v2346_v0  ;;  %s2431_s29 = sshll.u32 %s2636_s27, 6  ;;  %2224 = vset.pattern.permute.xlu0 %v2347_v33  ;;  %2225 = vset.pattern.permute.xlu1 %v2347_v33  ;;  %v2243_v35 = vld [vmem:[%s2627_s5 + $0x38] sm:$0xff]   ;;  %v2245_v37 = vld [vmem:[%s2627_s5 + $0x30] sm:$0xff]  }
   0xe   : > { %510 = vst.msk [vmem:[#allocation3 + $0x8] sm:$0xff] %vm508_vm0, %v2346_v0  ;;  %511 = vst.msk [vmem:[#allocation3 + $0x10] sm:$0xff] %vm508_vm0, %v2346_v0  ;;  %s2437_s10 = scalar_lea.vmem %s2622_s0, %s2431_s29  ;;  %s2447_s13 = scalar_lea.vmem %s2623_s1, %s2431_s29  ;;  %2182 = vmatprep.subr.bf16.mxu1 %v2242_v34  ;;  %v2246_v38 = vld [vmem:[%s2627_s5 + $0x68] sm:$0xff]   ;;  %v2248_v40 = vld [vmem:[%s2627_s5 + $0x60] sm:$0xff]  }
   0xf   : > { %512 = vst.msk [vmem:[#allocation3 + $0x18] sm:$0xff] %vm508_vm0, %v2346_v0  ;;  %514 = vst.msk [vmem:[#allocation3 + $0x28] sm:$0xff] %vm508_vm0, %v2346_v0  ;;  %v2440_v1 = vld [vmem:[%s2437_s10 + $0x10] sm:$0xff]   ;;  %v456_v2 = vld [vmem:[%s2437_s10] sm:$0xff]   ;;  %2190 = vmatpush3.bf16.msra.mxu1 %v2243_v35  ;;  %s2582_s15 = scalar_lea.vmem %s2629_s7, %s2431_s29 }
  0x10   : > { %515 = vst.msk [vmem:[#allocation3 + $0x30] sm:$0xff] %vm508_vm0, %v2346_v0  ;;  %516 = vst.msk [vmem:[#allocation3 + $0x38] sm:$0xff] %vm508_vm0, %v2346_v0  ;;  %v818_v3 = vunpack.c.l.bf16 %v2440_v1  ;;  %v814_v4 = vunpack.c.l.bf16 %v456_v2  ;;  %v2451_v5 = vld [vmem:[%s2437_s10 + $0x18] sm:$0xff]   ;;  %v819_v6 = vunpack.c.h.bf16 %v2440_v1  ;;  %v815_v7 = vunpack.c.h.bf16 %v456_v2  ;;  %v2234_v9 = vld [vmem:[%s2447_s13 + $0x30] sm:$0xff]   ;;  %2166 = vmatprep.mubr.bf16.mxu0 %v456_v2  ;;  %2183 = vmatprep.subr.bf16.mxu1 %v2244_v36 }
  0x11   : > { %517 = vst.msk [vmem:[#allocation3 + $0x40] sm:$0xff] %vm508_vm0, %v2346_v0  ;;  %518 = vst.msk [vmem:[#allocation3 + $0x48] sm:$0xff] %vm508_vm0, %v2346_v0  ;;  %v2233_v8 = vld [vmem:[%s2447_s13 + $0x38] sm:$0xff]   ;;  %v821_v10 = vunpack.c.h.bf16 %v2451_v5  ;;  %v459_v11 = vld [vmem:[%s2437_s10 + $0x8] sm:$0xff]   ;;  %v820_v12 = vunpack.c.l.bf16 %v2451_v5 }
  0x12   : > { %519 = vst.msk [vmem:[#allocation3 + $0x50] sm:$0xff] %vm508_vm0, %v2346_v0  ;;  %520 = vst.msk [vmem:[#allocation3 + $0x58] sm:$0xff] %vm508_vm0, %v2346_v0  ;;  %838 = vadd.xlane.f32.xlu0 %v818_v3  ;;  %830 = vadd.xlane.f32.xlu1 %v814_v4  ;;  %v2235_v13 = vld [vmem:[%s2447_s13 + $0x28] sm:$0xff]   ;;  %v465_v14 = vld [vmem:[%s2437_s10 + $0x20] sm:$0xff]   ;;  %v817_v16 = vunpack.c.h.bf16 %v459_v11  ;;  %v816_v17 = vunpack.c.l.bf16 %v459_v11 }
  0x13   : > { %521 = vst.msk [vmem:[#allocation3 + $0x60] sm:$0xff] %vm508_vm0, %v2346_v0  ;;  %522 = vst.msk [vmem:[#allocation3 + $0x68] sm:$0xff] %vm508_vm0, %v2346_v0  ;;  %2150 = vmatprep.subr.bf16.mxu0 %v2233_v8  ;;  %v2236_v15 = vld [vmem:[%s2447_s13 + $0x20] sm:$0xff]   ;;  %v823_v18 = vunpack.c.h.bf16 %v465_v14  ;;  %v467_v19 = vld [vmem:[%s2437_s10 + $0x28] sm:$0xff]   ;;  %v822_v20 = vunpack.c.l.bf16 %v465_v14  ;;  %2191 = vmatpush3.bf16.msra.mxu1 %v2245_v37 }
  0x14   : > { %523 = vst.msk [vmem:[#allocation3 + $0x70] sm:$0xff] %vm508_vm0, %v2346_v0  ;;  %524 = vst.msk [vmem:[#allocation3 + $0x78] sm:$0xff] %vm508_vm0, %v2346_v0  ;;  %2151 = vmatpush3.bf16.msra.mxu0 %v2233_v8  ;;  %v2237_v21 = vld [vmem:[%s2447_s13 + $0x18] sm:$0xff]   ;;  %v825_v22 = vunpack.c.h.bf16 %v467_v19  ;;  %v824_v23 = vunpack.c.l.bf16 %v467_v19  ;;  %v469_v24 = vld [vmem:[%s2437_s10 + $0x30] sm:$0xff]   ;;  %2184 = vmatprep.subr.bf16.mxu1 %v2246_v38 }
  0x15   : > { %2152 = vmatprep.subr.bf16.mxu0 %v2234_v9  ;;  %v2238_v25 = vld [vmem:[%s2447_s13 + $0x10] sm:$0xff]   ;;  %v827_v26 = vunpack.c.h.bf16 %v469_v24  ;;  %v826_v27 = vunpack.c.l.bf16 %v469_v24  ;;  %v471_v28 = vld [vmem:[%s2437_s10 + $0x38] sm:$0xff]   ;;  %v2239_v29 = vld [vmem:[%s2447_s13 + $0x8] sm:$0xff]  }
  0x16   : > { %840 = vadd.xlane.f32.xlu0 %v819_v6  ;;  %832 = vadd.xlane.f32.xlu1 %v815_v7  ;;  %v829_v30 = vunpack.c.h.bf16 %v471_v28  ;;  %v828_v31 = vunpack.c.l.bf16 %v471_v28  ;;  %v2240_v32 = vld [vmem:[%s2447_s13] sm:$0xff]   ;;  %v2247_v39 = vld [vmem:[%s2627_s5 + $0x28] sm:$0xff]   ;;  %v801_v59 = vld [vmem:[#allocation3 + $0x18] sm:$0xff]  ;;  %s2509_s13 = scalar_lea.vmem %s2624_s2, %s2431_s29  ;;  %s1903_s29 = sshll.u32 %s2636_s27, 1 }
  0x17   : > { %2192 = vmatpush3.bf16.msra.mxu1 %v2247_v39  ;;  %v802_v41 = vld [vmem:[#allocation3 + $0x20] sm:$0xff]  ;;  %v803_v47 = vld [vmem:[#allocation3 + $0x28] sm:$0xff]  ;;  %v805_v53 = vld [vmem:[#allocation3 + $0x38] sm:$0xff]  ;;  %s453_s18 = scalar_lea.vmem %s2630_s8, %s1903_s29 }
  0x18   : > { %2153 = vmatpush3.bf16.msra.mxu0 %v2234_v9  ;;  %2185 = vmatprep.subr.bf16.mxu1 %v2248_v40  ;;  %v798_v42 = vld [vmem:[#allocation3] sm:$0xff]  ;;  %v799_v48 = vld [vmem:[#allocation3 + $0x8] sm:$0xff]  ;;  %v804_v54 = vld [vmem:[#allocation3 + $0x30] sm:$0xff] }
  0x19   : > { %2154 = vmatprep.subr.bf16.mxu0 %v2235_v13  ;;  %v800_v60 = vld [vmem:[#allocation3 + $0x10] sm:$0xff]  ;;  %v807_v4 = vld [vmem:[#allocation3 + $0x48] sm:$0xff]  ;;  %v806_v6 = vld [vmem:[#allocation3 + $0x40] sm:$0xff] }
  0x1a   : > { %844 = vadd.xlane.f32.xlu1 %v821_v10  ;;  %842 = vadd.xlane.f32.xlu0 %v820_v12 }
  0x1c   : > { %2155 = vmatpush3.bf16.msra.mxu0 %v2235_v13 }
  0x1d   : > { %2156 = vmatprep.subr.bf16.mxu0 %v2236_v15 }
  0x1e   : > { %836 = vadd.xlane.f32.xlu1 %v817_v16  ;;  %834 = vadd.xlane.f32.xlu0 %v816_v17 }
  0x20   : > { %2157 = vmatpush3.bf16.msra.mxu0 %v2236_v15  ;;  %v808_v15 = vld [vmem:[#allocation3 + $0x50] sm:$0xff] }
  0x21   : > { %2158 = vmatprep.subr.bf16.mxu0 %v2237_v21 }
  0x22   : > { %848 = vadd.xlane.f32.xlu1 %v823_v18  ;;  %846 = vadd.xlane.f32.xlu0 %v822_v20  ;;  %v2249_v20 = vld [vmem:[%s2627_s5 + $0x20] sm:$0xff]  }
  0x23   : > { %2193 = vmatpush3.bf16.msra.mxu1 %v2249_v20 }
  0x24   : > { %2159 = vmatpush3.bf16.msra.mxu0 %v2237_v21 }
  0x25   : > { %2160 = vmatprep.subr.bf16.mxu0 %v2238_v25 }
  0x26   : > { %852 = vadd.xlane.f32.xlu1 %v825_v22  ;;  %850 = vadd.xlane.f32.xlu0 %v824_v23  ;;  %v811_v23 = vld [vmem:[#allocation3 + $0x68] sm:$0xff] }
  0x28   : > { %2161 = vmatpush3.bf16.msra.mxu0 %v2238_v25 }
  0x29   : > { %2162 = vmatprep.subr.bf16.mxu0 %v2239_v29 }
  0x2a   : > { %856 = vadd.xlane.f32.xlu1 %v827_v26  ;;  %854 = vadd.xlane.f32.xlu0 %v826_v27  ;;  %v2250_v26 = vld [vmem:[%s2627_s5 + $0x58] sm:$0xff]  }
  0x2b   : > { %2186 = vmatprep.subr.bf16.mxu1 %v2250_v26 }
  0x2c   : > { %2163 = vmatpush3.bf16.msra.mxu0 %v2239_v29 }
  0x2d   : > { %2164 = vmatprep.subr.bf16.mxu0 %v2240_v32 }
  0x2e   : > { %860 = vadd.xlane.f32.xlu1 %v829_v30  ;;  %858 = vadd.xlane.f32.xlu0 %v828_v31  ;;  %v2251_v30 = vld [vmem:[%s2627_s5 + $0x18] sm:$0xff]  }
  0x2f   : > { %2194 = vmatpush3.bf16.msra.mxu1 %v2251_v30 }
  0x30   : > { %2165 = vmatpush3.bf16.msra.mxu0 %v2240_v32  ;;  %v813_v32 = vld [vmem:[#allocation3 + $0x78] sm:$0xff] }
  0x31   : > { %2086 = vmatprep.subr.bf16.mxu0 %v2242_v34 }
  0x33   : > { %2167 = vmatmul.mubr.bf16.vlgmr.msra.gmra.mxu0 %v459_v11 }
  0x34   : > { %2170 = vmatprep.mubr.bf16.mxu0 %v2440_v1  ;;  %2087 = vmatpush3.bf16.msra.mxu0 %v2243_v35 }
  0x35   : > { %2088 = vmatprep.subr.bf16.mxu0 %v2244_v36  ;;  %v812_v36 = vld [vmem:[#allocation3 + $0x70] sm:$0xff] }
  0x38   : > { %2089 = vmatpush3.bf16.msra.mxu0 %v2245_v37  ;;  %v529_v37 = vld [vmem:[%s2509_s13 + $0x10] sm:$0xf] }
  0x39   : > { %2090 = vmatprep.subr.bf16.mxu0 %v2246_v38  ;;  %545 = vst [vmem:[#allocation4 + $0x24] sm:$0xf] %v529_v37 }
  0x3b   : > { %2171 = vmatmul.mubr.bf16.gmra.mxu0 %v2451_v5 }
  0x3c   : > { %2174 = vmatprep.mubr.bf16.mxu0 %v465_v14  ;;  %2091 = vmatpush3.bf16.msra.mxu0 %v2247_v39  ;;  %v809_v14 = vld [vmem:[#allocation3 + $0x58] sm:$0xff] }
  0x3d   : > { %2092 = vmatprep.subr.bf16.mxu0 %v2248_v40  ;;  %v2252_v40 = vld [vmem:[%s2627_s5 + $0x50] sm:$0xff]  }
  0x3e   : > { %2187 = vmatprep.subr.bf16.mxu1 %v2252_v40 }
  0x40   : > { %2093 = vmatpush3.bf16.msra.mxu0 %v2249_v20 }
  0x41   : > { %2094 = vmatprep.subr.bf16.mxu0 %v2250_v26 }
  0x43   : > { %2175 = vmatmul.mubr.bf16.gmra.mxu0 %v467_v19 }
  0x44   : > { %2178 = vmatprep.mubr.bf16.mxu0 %v469_v24  ;;  %v810_v24 = vld [vmem:[#allocation3 + $0x60] sm:$0xff]  ;;  %2095 = vmatpush3.bf16.msra.mxu0 %v2251_v30 }
  0x45   : > { %2096 = vmatprep.subr.bf16.mxu0 %v2252_v40 }
  0x4b   : > { %2179 = vmatmul.mubr.bf16.gmra.mxu0 %v471_v28 }
  0x9b   : > { %v839_v43 = vpop.xlane.xlu0 %838  ;;  %v831_v44 = vpop.xlane.xlu1 %830 }
  0x9c   : > { %v866_v45 = vadd.f32 %v839_v43, %v802_v41  ;;  %v862_v46 = vadd.f32 %v831_v44, %v798_v42  ;;  %v2253_v44 = vld [vmem:[%s2627_s5 + $0x10] sm:$0xff]  }
  0x9d   : > { %2195 = vmatpush3.bf16.msra.mxu1 %v2253_v44  ;;  %2097 = vmatpush3.bf16.msra.mxu0 %v2253_v44 }
  0x9e   : > { %883 = vst.msk [vmem:[#allocation3 + $0x20] sm:$0xff] %vm508_vm0, %v866_v45  ;;  %879 = vst.msk [vmem:[#allocation3] sm:$0xff] %vm508_vm0, %v862_v46 }
  0x9f   : > { %v841_v49 = vpop.xlane.xlu0 %840  ;;  %v833_v50 = vpop.xlane.xlu1 %832 }
  0xa0   : > { %v867_v51 = vadd.f32 %v841_v49, %v803_v47  ;;  %v863_v52 = vadd.f32 %v833_v50, %v799_v48  ;;  %v530_v49 = vld [vmem:[%s2509_s13 + $0x14] sm:$0xf] }
  0xa1   : > { %546 = vst [vmem:[#allocation4 + $0x2c] sm:$0xf] %v530_v49 }
  0xa2   : > { %884 = vst.msk [vmem:[#allocation3 + $0x28] sm:$0xff] %vm508_vm0, %v867_v51  ;;  %880 = vst.msk [vmem:[#allocation3 + $0x8] sm:$0xff] %vm508_vm0, %v863_v52  ;;  %v2254_v52 = vld [vmem:[%s2627_s5 + $0x48] sm:$0xff]  }
  0xa3   : > { %v845_v55 = vpop.xlane.xlu1 %844  ;;  %v843_v56 = vpop.xlane.xlu0 %842  ;;  %2188 = vmatprep.subr.bf16.mxu1 %v2254_v52  ;;  %2098 = vmatprep.subr.bf16.mxu0 %v2254_v52 }
  0xa4   : > { %v869_v57 = vadd.f32 %v845_v55, %v805_v53  ;;  %v868_v58 = vadd.f32 %v843_v56, %v804_v54  ;;  %v2255_v55 = vld [vmem:[%s2627_s5 + $0x8] sm:$0xff]  }
  0xa5   : > { %v902_v61 = vld [vmem:[#allocation3 + $0x20] sm:$0xff]  ;;  %2196 = vmatpush3.bf16.msra.mxu1 %v2255_v55  ;;  %2099 = vmatpush3.bf16.msra.mxu0 %v2255_v55 }
  0xa6   : > { %886 = vst.msk [vmem:[#allocation3 + $0x38] sm:$0xff] %vm508_vm0, %v869_v57  ;;  %885 = vst.msk [vmem:[#allocation3 + $0x30] sm:$0xff] %vm508_vm0, %v868_v58  ;;  %v918_v62 = vmax.f32 %v902_v61, 1.0  ;;  %v898_v1 = vld [vmem:[#allocation3] sm:$0xff] }
  0xa7   : > { %v837_v63 = vpop.xlane.xlu1 %836  ;;  %v835_v0 = vpop.xlane.xlu0 %834  ;;  %v914_v8 = vmax.f32 %v898_v1, 1.0  ;;  %v525_v57 = vld [vmem:[%s2509_s13] sm:$0xf]  ;;  %v526_v1 = vld [vmem:[%s2509_s13 + $0x4] sm:$0xf] }
  0xa8   : > { %v865_v2 = vadd.f32 %v837_v63, %v801_v59  ;;  %v864_v3 = vadd.f32 %v835_v0, %v800_v60  ;;  %2290 = vrcp.f32 %v918_v62  ;;  %v2256_v60 = vld [vmem:[%s2627_s5 + $0x40] sm:$0xff]   ;;  %541 = vst [vmem:[#allocation4 + $0x4] sm:$0xf] %v525_v57  ;;  %542 = vst [vmem:[#allocation4 + $0xc] sm:$0xf] %v526_v1 }
  0xa9   : > { %v903_v5 = vld [vmem:[#allocation3 + $0x28] sm:$0xff]  ;;  %v2257_v63 = vld [vmem:[%s2627_s5] sm:$0xff]   ;;  %2189 = vmatprep.subr.bf16.mxu1 %v2256_v60  ;;  %2100 = vmatprep.subr.bf16.mxu0 %v2256_v60 }
  0xaa   : > { %882 = vst.msk [vmem:[#allocation3 + $0x18] sm:$0xff] %vm508_vm0, %v865_v2  ;;  %881 = vst.msk [vmem:[#allocation3 + $0x10] sm:$0xff] %vm508_vm0, %v864_v3  ;;  %v919_v7 = vmax.f32 %v903_v5, 1.0  ;;  %v899_v11 = vld [vmem:[#allocation3 + $0x8] sm:$0xff]  ;;  %2197 = vmatpush3.bf16.msra.mxu1 %v2257_v63  ;;  %2101 = vmatpush3.bf16.msra.mxu0 %v2257_v63 }
  0xab   : > { %v849_v9 = vpop.xlane.xlu1 %848  ;;  %v847_v10 = vpop.xlane.xlu0 %846  ;;  %v915_v16 = vmax.f32 %v899_v11, 1.0  ;;  %v2260_v63 = vld [vmem:[#allocation4 + $0x24] ss:$8 sps:$4 sm:$0xff]  }
  0xac   : > { %v871_v12 = vadd.f32 %v849_v9, %v807_v4  ;;  %2292 = vrcp.f32 %v919_v7  ;;  %v870_v13 = vadd.f32 %v847_v10, %v806_v6  ;;  %v531_v7 = vld [vmem:[%s2509_s13 + $0x18] sm:$0xf]  ;;  %1433 = vmatprep.mubr.bf16.mxu1 %v2260_v63 }
  0xad   : > { %2294 = vrcp.f32 %v914_v8  ;;  %v904_v19 = vld [vmem:[#allocation3 + $0x30] sm:$0xff]  ;;  %v905_v29 = vld [vmem:[#allocation3 + $0x38] sm:$0xff]  ;;  %v534_v8 = vld [vmem:[%s2509_s13 + $0x24] sm:$0xf]  ;;  %547 = vst [vmem:[#allocation4 + $0x34] sm:$0xf] %v531_v7 }
  0xae   : > { %888 = vst.msk [vmem:[#allocation3 + $0x48] sm:$0xff] %vm508_vm0, %v871_v12  ;;  %887 = vst.msk [vmem:[#allocation3 + $0x40] sm:$0xff] %vm508_vm0, %v870_v13  ;;  %2296 = vrcp.f32 %v915_v16  ;;  %v920_v25 = vmax.f32 %v904_v19, 1.0  ;;  %v921_v39 = vmax.f32 %v905_v29, 1.0  ;;  %v532_v13 = vld [vmem:[%s2509_s13 + $0x1c] sm:$0xf] }
  0xaf   : > { %v853_v17 = vpop.xlane.xlu1 %852  ;;  %v851_v18 = vpop.xlane.xlu0 %850  ;;  %550 = vst [vmem:[#allocation4 + $0x4c] sm:$0xf] %v534_v8  ;;  %548 = vst [vmem:[#allocation4 + $0x3c] sm:$0xf] %v532_v13  ;;  %v527_v19 = vld [vmem:[%s2509_s13 + $0x8] sm:$0xf] }
  0xb0   : > { %v873_v21 = vadd.f32 %v853_v17, %v809_v14  ;;  %v872_v22 = vadd.f32 %v851_v18, %v808_v15  ;;  %2298 = vrcp.f32 %v920_v25  ;;  %v536_v14 = vld [vmem:[%s2509_s13 + $0x2c] sm:$0xf]  ;;  %543 = vst [vmem:[#allocation4 + $0x14] sm:$0xf] %v527_v19  ;;  %v540_v25 = vld [vmem:[%s2509_s13 + $0x3c] sm:$0xf] }
  0xb1   : > { %v900_v43 = vld [vmem:[#allocation3 + $0x10] sm:$0xff]  ;;  %v901_v54 = vld [vmem:[#allocation3 + $0x18] sm:$0xff]  ;;  %552 = vst [vmem:[#allocation4 + $0x5c] sm:$0xf] %v536_v14  ;;  %556 = vst [vmem:[#allocation4 + $0x7c] sm:$0xf] %v540_v25 }
  0xb2   : > { %890 = vst.msk [vmem:[#allocation3 + $0x58] sm:$0xff] %vm508_vm0, %v873_v21  ;;  %889 = vst.msk [vmem:[#allocation3 + $0x50] sm:$0xff] %vm508_vm0, %v872_v22  ;;  %v916_v51 = vmax.f32 %v900_v43, 1.0  ;;  %v917_v59 = vmax.f32 %v901_v54, 1.0  ;;  %v538_v21 = vld [vmem:[%s2509_s13 + $0x34] sm:$0xf] }
  0xb3   : > { %v857_v27 = vpop.xlane.xlu1 %856  ;;  %v855_v28 = vpop.xlane.xlu0 %854  ;;  %554 = vst [vmem:[#allocation4 + $0x6c] sm:$0xf] %v538_v21  ;;  %v535_v29 = vld [vmem:[%s2509_s13 + $0x28] sm:$0xf] }
  0xb4   : > { %v875_v31 = vadd.f32 %v857_v27, %v811_v23  ;;  %v874_v33 = vadd.f32 %v855_v28, %v810_v24  ;;  %v528_v24 = vld [vmem:[%s2509_s13 + $0xc] sm:$0xf]  ;;  %v533_v27 = vld [vmem:[%s2509_s13 + $0x20] sm:$0xf]  ;;  %551 = vst [vmem:[#allocation4 + $0x54] sm:$0xf] %v535_v29 }
  0xb5   : > { %v2291_v34 = vpop.eup %2290  ;;  %v907_v35 = vld [vmem:[#allocation3 + $0x48] sm:$0xff]  ;;  %v906_v62 = vld [vmem:[#allocation3 + $0x40] sm:$0xff]  ;;  %544 = vst [vmem:[#allocation4 + $0x1c] sm:$0xf] %v528_v24  ;;  %549 = vst [vmem:[#allocation4 + $0x44] sm:$0xf] %v533_v27 }
  0xb6   : > { %892 = vst.msk [vmem:[#allocation3 + $0x68] sm:$0xff] %vm508_vm0, %v875_v31  ;;  %1000 = vperm.xlu0 %2224, %v2291_v34   ;;  %891 = vst.msk [vmem:[#allocation3 + $0x60] sm:$0xff] %vm508_vm0, %v874_v33  ;;  %v923_v38 = vmax.f32 %v907_v35, 1.0  ;;  %v922_v3 = vmax.f32 %v906_v62, 1.0  ;;  %v537_v31 = vld [vmem:[%s2509_s13 + $0x30] sm:$0xf] }
  0xb7   : > { %v861_v41 = vpop.xlane.xlu1 %860  ;;  %v859_v42 = vpop.xlane.xlu0 %858  ;;  %553 = vst [vmem:[#allocation4 + $0x64] sm:$0xf] %v537_v31  ;;  %v539_v33 = vld [vmem:[%s2509_s13 + $0x38] sm:$0xf]  ;;  %v2264_v27 = vld [vmem:[#allocation4 + $0x34] ss:$8 sps:$4 sm:$0xff]  }
  0xb8   : > { %v877_v45 = vadd.f32 %v861_v41, %v813_v32  ;;  %2300 = vrcp.f32 %v923_v38  ;;  %v876_v46 = vadd.f32 %v859_v42, %v812_v36  ;;  %555 = vst [vmem:[#allocation4 + $0x74] sm:$0xf] %v539_v33 }
  0xb9   : > { %v2293_v47 = vpop.eup %2292  ;;  %v909_v48 = vld [vmem:[#allocation3 + $0x58] sm:$0xff]  ;;  %2302 = vrcp.f32 %v921_v39  ;;  %v908_v5 = vld [vmem:[#allocation3 + $0x50] sm:$0xff] }
  0xba   : > { %894 = vst.msk [vmem:[#allocation3 + $0x78] sm:$0xff] %vm508_vm0, %v877_v45  ;;  %1005 = vperm.xlu1 %2225, %v2293_v47   ;;  %893 = vst.msk [vmem:[#allocation3 + $0x70] sm:$0xff] %vm508_vm0, %v876_v46  ;;  %v925_v50 = vmax.f32 %v909_v48, 1.0  ;;  %v2295_v53 = vpop.eup %2294  ;;  %v924_v9 = vmax.f32 %v908_v5, 1.0 }
  0xbb   : > { %v2297_v61 = vpop.eup %2296 }
  0xbc   : > { %2304 = vrcp.f32 %v925_v50 }
  0xbd   : > { %v911_v56 = vld [vmem:[#allocation3 + $0x68] sm:$0xff]  ;;  %2306 = vrcp.f32 %v916_v51  ;;  %v2299_v4 = vpop.eup %2298  ;;  %v910_v11 = vld [vmem:[#allocation3 + $0x60] sm:$0xff] }
  0xbe   : > { %980 = vperm.xlu1 %2225, %v2295_v53   ;;  %v927_v58 = vmax.f32 %v911_v56, 1.0  ;;  %v926_v15 = vmax.f32 %v910_v11, 1.0 }
  0xc0   : > { %2308 = vrcp.f32 %v927_v58 }
  0xc1   : > { %v913_v0 = vld [vmem:[#allocation3 + $0x78] sm:$0xff]  ;;  %2310 = vrcp.f32 %v917_v59  ;;  %v912_v17 = vld [vmem:[#allocation3 + $0x70] sm:$0xff] }
  0xc2   : > { %985 = vperm.xlu1 %2225, %v2297_v61   ;;  %v929_v2 = vmax.f32 %v913_v0, 1.0  ;;  %v928_v20 = vmax.f32 %v912_v17, 1.0 }
  0xc4   : > { %2312 = vrcp.f32 %v929_v2 }
  0xc5   : > { %v2301_v6 = vpop.eup %2300  ;;  %2314 = vrcp.f32 %v922_v3 }
  0xc6   : > { %1010 = vperm.xlu1 %2225, %v2299_v4   ;;  %1025 = vperm.xlu0 %2224, %v2301_v6   ;;  %v2303_v10 = vpop.eup %2302  ;;  %2316 = vrcp.f32 %v924_v9 }
  0xc7   : > { %2318 = vrcp.f32 %v926_v15  ;;  %v2263_v15 = vld [vmem:[#allocation4 + $0x4] ss:$8 sps:$4 sm:$0xff]  }
  0xc8   : > { %2320 = vrcp.f32 %v928_v20  ;;  %1417 = vmatprep.mubr.bf16.mxu0 %v2263_v15 }
  0xc9   : > { %v2305_v12 = vpop.eup %2304 }
  0xca   : > { %1015 = vperm.xlu1 %2225, %v2303_v10   ;;  %1035 = vperm.xlu0 %2224, %v2305_v12   ;;  %v2307_v16 = vpop.eup %2306 }
  0xcd   : > { %v2309_v18 = vpop.eup %2308 }
  0xce   : > { %990 = vperm.xlu1 %2225, %v2307_v16   ;;  %1045 = vperm.xlu0 %2224, %v2309_v18   ;;  %v2311_v22 = vpop.eup %2310 }
  0xd1   : > { %v2313_v23 = vpop.eup %2312 }
  0xd2   : > { %995 = vperm.xlu1 %2225, %v2311_v22   ;;  %1055 = vperm.xlu0 %2224, %v2313_v23   ;;  %v2315_v26 = vpop.eup %2314 }
  0xd3   : > { %v2317_v28 = vpop.eup %2316 }
  0xd4   : > { %v2319_v30 = vpop.eup %2318 }
  0xd5   : > { %v2321_v32 = vpop.eup %2320 }
  0xd6   : > { %1020 = vperm.xlu1 %2225, %v2315_v26  }
  0xda   : > { %1030 = vperm.xlu1 %2225, %v2317_v28  }
  0xde   : > { %1040 = vperm.xlu1 %2225, %v2319_v30  }
  0xe2   : > { %1050 = vperm.xlu1 %2225, %v2321_v32  }
  0xf3   : > { %v2168_v34 = vpop.f32.mrf.mxu0 }
  0xf5   : > { %v703_v35 = vpop.f32.mrf.mxu0 }
  0xf7   : > { %v2557_v36 = vpop.f32.mrf.mxu0 }
  0xf9   : > { %v706_v37 = vpop.f32.mrf.mxu0 }
  0xfb   : > { %v2172_v38 = vpop.f32.mrf.mxu0 }
  0xfd   : > { %v719_v39 = vpop.f32.mrf.mxu0 }
  0xff   : > { %v2173_v40 = vpop.f32.mrf.mxu0 }
 0x101   : > { %v722_v41 = vpop.f32.mrf.mxu0 }
 0x103   : > { %v2559_v42 = vpop.f32.mrf.mxu0 }
 0x105   : > { %v2561_v43 = vpop.f32.mrf.mxu0 }
 0x107   : > { %v2177_v46 = vpop.f32.mrf.mxu0 }
 0x109   : > { %v738_v50 = vpop.f32.mrf.mxu0 }
 0x10b   : > { %v2563_v54 = vpop.f32.mrf.mxu0 }
 0x10d   : > { %v751_v58 = vpop.f32.mrf.mxu0 }
 0x10f   : > { %v2181_v2 = vpop.f32.mrf.mxu0 }
 0x111   : > { %v754_v9 = vpop.f32.mrf.mxu0 }
 0x131   : > { %v1001_v44 = vpop.permute.xlu0 %1000 }
 0x132   : > { %v1062_v45 = vmul.f32 %v1001_v44, %v719_v39 }
 0x134   : > { %v1995_v47 = vpack.c.bf16 %v1062_v45, %v1062_v45  ;;  %v2273_v45 = vld [vmem:[#allocation4 + $0x54] ss:$8 sps:$4 sm:$0xff]  }
 0x135   : > { %v1006_v48 = vpop.permute.xlu1 %1005 }
 0x136   : > { %1142 = vst [vmem:[#allocation4 + $0x20] sm:$0xf] %v1995_v47  ;;  %v1063_v49 = vmul.f32 %v1006_v48, %v722_v41  ;;  %v2279_v48 = vld [vmem:[#allocation4 + $0x74] ss:$8 sps:$4 sm:$0xff]  }
 0x138   : > { %v1996_v51 = vpack.c.bf16 %v1063_v49, %v1063_v49 }
 0x139   : > { %v981_v52 = vpop.permute.xlu1 %980 }
 0x13a   : > { %1143 = vst [vmem:[#allocation4 + $0x28] sm:$0xf] %v1996_v51  ;;  %v1058_v53 = vmul.f32 %v981_v52, %v703_v35  ;;  %v2267_v35 = vld [vmem:[#allocation4 + $0x14] ss:$8 sps:$4 sm:$0xff]  }
 0x13c   : > { %v1991_v55 = vpack.c.bf16 %v1058_v53, %v1058_v53 }
 0x13d   : > { %v986_v56 = vpop.permute.xlu1 %985 }
 0x13e   : > { %1138 = vst [vmem:[#allocation4] sm:$0xf] %v1991_v55  ;;  %v1059_v57 = vmul.f32 %v986_v56, %v706_v37 }
 0x140   : > { %v1992_v59 = vpack.c.bf16 %v1059_v57, %v1059_v57 }
 0x141   : > { %v1026_v60 = vpop.permute.xlu0 %1025  ;;  %v1011_v61 = vpop.permute.xlu1 %1010  ;;  %v2258_v62 = vld [vmem:[#allocation4 + $0x20] ss:$8 sps:$4 sm:$0xff]  }
 0x142   : > { %1139 = vst [vmem:[#allocation4 + $0x8] sm:$0xf] %v1992_v59  ;;  %v1064_v0 = vmul.f32 %v2172_v38, %v1011_v61  ;;  %v1067_v1 = vmul.f32 %v1026_v60, %v738_v50  ;;  %1434 = vmatmul.mubr.bf16.vlgmr.msra.gmra.mxu1 %v2258_v62 }
 0x143   : > { %1441 = vmatprep.mubr.bf16.mxu1 %v2264_v27 }
 0x144   : > { %v1997_v3 = vpack.c.bf16 %v1064_v0, %v1064_v0  ;;  %v2000_v4 = vpack.c.bf16 %v1067_v1, %v1067_v1 }
 0x145   : > { %v1036_v5 = vpop.permute.xlu0 %1035  ;;  %v1016_v6 = vpop.permute.xlu1 %1015 }
 0x146   : > { %1144 = vst [vmem:[#allocation4 + $0x30] sm:$0xf] %v1997_v3  ;;  %1147 = vst [vmem:[#allocation4 + $0x48] sm:$0xf] %v2000_v4  ;;  %v1069_v7 = vmul.f32 %v2177_v46, %v1036_v5  ;;  %v1065_v8 = vmul.f32 %v2173_v40, %v1016_v6  ;;  %v2270_v40 = vld [vmem:[#allocation4 + $0x44] ss:$8 sps:$4 sm:$0xff]  }
 0x147   : > { %v2276_v46 = vld [vmem:[#allocation4 + $0x64] ss:$8 sps:$4 sm:$0xff]  }
 0x148   : > { %v2002_v10 = vpack.c.bf16 %v1069_v7, %v1069_v7  ;;  %v1998_v11 = vpack.c.bf16 %v1065_v8, %v1065_v8 }
 0x149   : > { %v1046_v12 = vpop.permute.xlu0 %1045  ;;  %v991_v13 = vpop.permute.xlu1 %990  ;;  %v2261_v14 = vld [vmem:[#allocation4] ss:$8 sps:$4 sm:$0xff]  }
 0x14a   : > { %1149 = vst [vmem:[#allocation4 + $0x58] sm:$0xf] %v2002_v10  ;;  %1145 = vst [vmem:[#allocation4 + $0x38] sm:$0xf] %v1998_v11  ;;  %v1060_v16 = vmul.f32 %v2168_v34, %v991_v13  ;;  %v1071_v17 = vmul.f32 %v1046_v12, %v754_v9  ;;  %1418 = vmatmul.mubr.bf16.vlgmr.msra.gmra.mxu0 %v2261_v14 }
 0x14b   : > { %1425 = vmatprep.mubr.bf16.mxu0 %v2267_v35 }
 0x14c   : > { %v1993_v18 = vpack.c.bf16 %v1060_v16, %v1060_v16  ;;  %v2004_v19 = vpack.c.bf16 %v1071_v17, %v1071_v17 }
 0x14d   : > { %v1056_v20 = vpop.permute.xlu0 %1055  ;;  %v996_v21 = vpop.permute.xlu1 %995 }
 0x14e   : > { %1140 = vst [vmem:[#allocation4 + $0x10] sm:$0xf] %v1993_v18  ;;  %1151 = vst [vmem:[#allocation4 + $0x68] sm:$0xf] %v2004_v19  ;;  %v1073_v22 = vmul.f32 %v2181_v2, %v1056_v20  ;;  %v1061_v23 = vmul.f32 %v2557_v36, %v996_v21 }
 0x150   : > { %v2006_v24 = vpack.c.bf16 %v1073_v22, %v1073_v22  ;;  %v1994_v25 = vpack.c.bf16 %v1061_v23, %v1061_v23 }
 0x151   : > { %v1021_v26 = vpop.permute.xlu1 %1020  ;;  %v2266_v28 = vld [vmem:[#allocation4 + $0x30] ss:$8 sps:$4 sm:$0xff]  }
 0x152   : > { %1153 = vst [vmem:[#allocation4 + $0x78] sm:$0xf] %v2006_v24  ;;  %1141 = vst [vmem:[#allocation4 + $0x18] sm:$0xf] %v1994_v25  ;;  %v1066_v29 = vmul.f32 %v1021_v26, %v2561_v43  ;;  %1442 = vmatmul.mubr.bf16.gmra.mxu1 %v2266_v28 }
 0x153   : > { %1449 = vmatprep.mubr.bf16.mxu1 %v2270_v40 }
 0x154   : > { %v1999_v30 = vpack.c.bf16 %v1066_v29, %v1066_v29 }
 0x155   : > { %v1031_v31 = vpop.permute.xlu1 %1030 }
 0x156   : > { %1146 = vst [vmem:[#allocation4 + $0x40] sm:$0xf] %v1999_v30  ;;  %v1068_v32 = vmul.f32 %v2559_v42, %v1031_v31 }
 0x158   : > { %v2001_v33 = vpack.c.bf16 %v1068_v32, %v1068_v32 }
 0x159   : > { %v1041_v34 = vpop.permute.xlu1 %1040  ;;  %v2269_v36 = vld [vmem:[#allocation4 + $0x10] ss:$8 sps:$4 sm:$0xff]  }
 0x15a   : > { %1148 = vst [vmem:[#allocation4 + $0x50] sm:$0xf] %v2001_v33  ;;  %v1070_v37 = vmul.f32 %v1041_v34, %v751_v58  ;;  %1426 = vmatmul.mubr.bf16.gmra.mxu0 %v2269_v36 }
 0x15c   : > { %v2003_v38 = vpack.c.bf16 %v1070_v37, %v1070_v37 }
 0x15d   : > { %v1051_v39 = vpop.permute.xlu1 %1050  ;;  %v2272_v41 = vld [vmem:[#allocation4 + $0x40] ss:$8 sps:$4 sm:$0xff]  }
 0x15e   : > { %1150 = vst [vmem:[#allocation4 + $0x60] sm:$0xf] %v2003_v38  ;;  %v1072_v43 = vmul.f32 %v2563_v54, %v1051_v39  ;;  %1450 = vmatmul.mubr.bf16.gmra.mxu1 %v2272_v41  ;;  %v2572_v54 = vld [vmem:[%s2628_s6] ss:$0 sm:$0xff] }
 0x15f   : > { %1457 = vmatprep.mubr.bf16.mxu1 %v2273_v45 }
 0x160   : > { %v2005_v44 = vpack.c.bf16 %v1072_v43, %v1072_v43 }
 0x161   : > { %v2275_v42 = vld [vmem:[#allocation4 + $0x50] ss:$8 sps:$4 sm:$0xff]  }
 0x162   : > { %1152 = vst [vmem:[#allocation4 + $0x70] sm:$0xf] %v2005_v44 }
 0x165   : > { %v2278_v47 = vld [vmem:[#allocation4 + $0x60] ss:$8 sps:$4 sm:$0xff]  }
 0x166   : > { %1458 = vmatmul.mubr.bf16.gmra.mxu1 %v2275_v42 }
 0x167   : > { %1465 = vmatprep.mubr.bf16.mxu1 %v2276_v46 }
 0x169   : > { %v2281_v49 = vld [vmem:[#allocation4 + $0x70] ss:$8 sps:$4 sm:$0xff]  }
 0x16e   : > { %1466 = vmatmul.mubr.bf16.gmra.mxu1 %v2278_v47 }
 0x16f   : > { %1473 = vmatprep.mubr.bf16.mxu1 %v2279_v48 }
 0x176   : > { %1474 = vmatmul.mubr.bf16.gmra.mxu1 %v2281_v49 }
 0x202   : > { %v2114_v50 = vpop.f32.mrf.mxu1 }
 0x204   : > { %v2115_v51 = vpop.f32.mrf.mxu1 }
 0x205   : > { %v2116_v53 = vadd.f32 %v2115_v51, %v2114_v50 }
 0x206   : > { %v2117_v52 = vpop.f32.mrf.mxu1 }
 0x207   : > { %v1436_v58 = vadd.f32 %v2116_v53, %v2572_v54 }
 0x208   : > { %v2118_v55 = vpop.f32.mrf.mxu1 }
 0x209   : > { %v2119_v56 = vadd.f32 %v2118_v55, %v2117_v52  ;;  %v1648_v30 = vmul.f32 0.0, %v1436_v58 }
 0x20a   : > { %v2102_v57 = vpop.f32.mrf.mxu0 }
 0x20b   : > { %v2576_v59 = vadd.f32 %v2119_v56, %v2572_v54  ;;  %v1686_v47 = vmul.f32 %v1648_v30, %v1436_v58 }
 0x20c   : > { %v2103_v60 = vpop.f32.mrf.mxu0 }
 0x20d   : > { %v2036_v61 = vpack.c.bf16 %v2576_v59, %v1436_v58  ;;  %v2104_v63 = vadd.f32 %v2103_v60, %v2102_v57  ;;  %v1649_v39 = vmul.f32 0.0, %v2576_v59 }
 0x20e   : > { %v2105_v62 = vpop.f32.mrf.mxu0 }
 0x20f   : > { %2064 = vst [vmem:[%s2582_s15 + $0x10] sm:$0xff] %v2036_v61   ;;  %v1420_v3 = vadd.f32 %v2104_v63, %v2572_v54  ;;  %v1687_v55 = vmul.f32 %v1649_v39, %v2576_v59 }
 0x210   : > { %v2106_v0 = vpop.f32.mrf.mxu0 }
 0x211   : > { %v2107_v1 = vadd.f32 %v2106_v0, %v2105_v62  ;;  %v1682_v26 = vmul.f32 %v1420_v3, %v1420_v3 }
 0x212   : > { %v2120_v2 = vpop.f32.mrf.mxu1 }
 0x213   : > { %v1423_v4 = vadd.f32 %v2107_v1, %v2572_v54 }
 0x214   : > { %v2121_v5 = vpop.f32.mrf.mxu1 }
 0x215   : > { %v2026_v6 = vpack.c.bf16 %v1423_v4, %v1420_v3  ;;  %v2122_v8 = vadd.f32 %v2121_v5, %v2120_v2  ;;  %v1683_v22 = vmul.f32 %v1423_v4, %v1423_v4  ;;  %v1660_v27 = vadd.f32 %v1423_v4, %v1420_v3 }
 0x216   : > { %v2123_v7 = vpop.f32.mrf.mxu1 }
 0x217   : > { %2027 = vst [vmem:[%s2582_s15] sm:$0xff] %v2026_v6   ;;  %v1444_v12 = vadd.f32 %v2122_v8, %v2572_v54  ;;  %v1698_v33 = vadd.f32 %v1683_v22, %v1682_v26 }
 0x218   : > { %v2124_v9 = vpop.f32.mrf.mxu1 }
 0x219   : > { %v2125_v10 = vadd.f32 %v2124_v9, %v2123_v7  ;;  %v1650_v44 = vmul.f32 0.0, %v1444_v12 }
 0x21a   : > { %v2108_v11 = vpop.f32.mrf.mxu0 }
 0x21b   : > { %v1447_v13 = vadd.f32 %v2125_v10, %v2572_v54  ;;  %v1688_v60 = vmul.f32 %v1650_v44, %v1444_v12 }
 0x21c   : > { %v2109_v14 = vpop.f32.mrf.mxu0 }
 0x21d   : > { %v2041_v15 = vpack.c.bf16 %v1447_v13, %v1444_v12  ;;  %v2110_v16 = vadd.f32 %v2109_v14, %v2108_v11  ;;  %v1651_v51 = vmul.f32 0.0, %v1447_v13 }
 0x21e   : > { %v2111_v17 = vpop.f32.mrf.mxu0  ;;  %v2126_v18 = vpop.f32.mrf.mxu1 }
 0x21f   : > { %2065 = vst [vmem:[%s2582_s15 + $0x18] sm:$0xff] %v2041_v15   ;;  %v1428_v19 = vadd.f32 %v2110_v16, %v2572_v54  ;;  %v1689_v58 = vmul.f32 %v1651_v51, %v1447_v13 }
 0x220   : > { %v2112_v20 = vpop.f32.mrf.mxu0  ;;  %v2127_v21 = vpop.f32.mrf.mxu1 }
 0x221   : > { %v1646_v23 = vmul.f32 0.0, %v1428_v19  ;;  %v2113_v24 = vadd.f32 %v2112_v20, %v2111_v17  ;;  %v2128_v31 = vadd.f32 %v2127_v21, %v2126_v18 }
 0x222   : > { %v2129_v25 = vpop.f32.mrf.mxu1 }
 0x223   : > { %v1684_v28 = vmul.f32 %v1646_v23, %v1428_v19  ;;  %v1431_v29 = vadd.f32 %v2113_v24, %v2572_v54  ;;  %v1661_v34 = vadd.f32 %v1660_v27, %v1646_v23  ;;  %v1452_v45 = vadd.f32 %v2128_v31, %v2572_v54 }
 0x224   : > { %v2130_v32 = vpop.f32.mrf.mxu1 }
 0x225   : > { %v2031_v35 = vpack.c.bf16 %v1431_v29, %v1428_v19  ;;  %v1647_v36 = vmul.f32 0.0, %v1431_v29  ;;  %v2131_v37 = vadd.f32 %v2130_v32, %v2129_v25  ;;  %v1699_v40 = vadd.f32 %v1698_v33, %v1684_v28 }
 0x226   : > { %v2132_v38 = vpop.f32.mrf.mxu1  ;;  %v1652_v61 = vmul.f32 0.0, %v1452_v45 }
 0x227   : > { %2063 = vst [vmem:[%s2582_s15 + $0x8] sm:$0xff] %v2031_v35   ;;  %v1662_v41 = vadd.f32 %v1661_v34, %v1647_v36  ;;  %v1685_v43 = vmul.f32 %v1647_v36, %v1431_v29  ;;  %v1455_v42 = vadd.f32 %v2131_v37, %v2572_v54 }
 0x228   : > { %v2133_v46 = vpop.f32.mrf.mxu1  ;;  %v1690_v59 = vmul.f32 %v1652_v61, %v1452_v45 }
 0x229   : > { %v1663_v48 = vadd.f32 %v1662_v41, %v1648_v30  ;;  %v1700_v49 = vadd.f32 %v1699_v40, %v1685_v43  ;;  %v2134_v50 = vadd.f32 %v2133_v46, %v2132_v38  ;;  %v2046_v52 = vpack.c.bf16 %v1455_v42, %v1452_v45 }
 0x22a   : > { %v2135_v53 = vpop.f32.mrf.mxu1  ;;  %v1653_v6 = vmul.f32 0.0, %v1455_v42 }
 0x22b   : > { %v1664_v56 = vadd.f32 %v1663_v48, %v1649_v39  ;;  %v1701_v57 = vadd.f32 %v1700_v49, %v1686_v47  ;;  %2066 = vst [vmem:[%s2582_s15 + $0x20] sm:$0xff] %v2046_v52   ;;  %v1460_v1 = vadd.f32 %v2134_v50, %v2572_v54 }
 0x22c   : > { %v2136_v62 = vpop.f32.mrf.mxu1  ;;  %v1691_v19 = vmul.f32 %v1653_v6, %v1455_v42 }
 0x22d   : > { %v1702_v63 = vadd.f32 %v1701_v57, %v1687_v55  ;;  %v1665_v0 = vadd.f32 %v1664_v56, %v1650_v44  ;;  %v2137_v2 = vadd.f32 %v2136_v62, %v2135_v53  ;;  %v1654_v11 = vmul.f32 0.0, %v1460_v1 }
 0x22e   : > { %v2138_v3 = vpop.f32.mrf.mxu1 }
 0x22f   : > { %v1666_v4 = vadd.f32 %v1665_v0, %v1651_v51  ;;  %v1703_v5 = vadd.f32 %v1702_v63, %v1688_v60  ;;  %v1463_v7 = vadd.f32 %v2137_v2, %v2572_v54  ;;  %v1692_v23 = vmul.f32 %v1654_v11, %v1460_v1 }
 0x230   : > { %v2139_v8 = vpop.f32.mrf.mxu1 }
 0x231   : > { %v1667_v9 = vadd.f32 %v1666_v4, %v1652_v61  ;;  %v1704_v10 = vadd.f32 %v1703_v5, %v1689_v58  ;;  %v2051_v12 = vpack.c.bf16 %v1463_v7, %v1460_v1  ;;  %v1655_v14 = vmul.f32 0.0, %v1463_v7 }
 0x232   : > { %v2140_v15 = vadd.f32 %v2139_v8, %v2138_v3  ;;  %v2141_v16 = vpop.f32.mrf.mxu1 }
 0x233   : > { %v1705_v17 = vadd.f32 %v1704_v10, %v1690_v59  ;;  %v1668_v18 = vadd.f32 %v1667_v9, %v1653_v6  ;;  %2067 = vst [vmem:[%s2582_s15 + $0x28] sm:$0xff] %v2051_v12   ;;  %v1693_v25 = vmul.f32 %v1655_v14, %v1463_v7 }
 0x234   : > { %v1468_v13 = vadd.f32 %v2140_v15, %v2572_v54  ;;  %v2142_v20 = vpop.f32.mrf.mxu1 }
 0x235   : > { %v1706_v21 = vadd.f32 %v1705_v17, %v1691_v19  ;;  %v1669_v22 = vadd.f32 %v1668_v18, %v1654_v11  ;;  %v2143_v24 = vadd.f32 %v2142_v20, %v2141_v16 }
 0x236   : > { %v2144_v26 = vpop.f32.mrf.mxu1  ;;  %v1656_v29 = vmul.f32 0.0, %v1468_v13 }
 0x237   : > { %v1707_v27 = vadd.f32 %v1706_v21, %v1692_v23  ;;  %v1670_v28 = vadd.f32 %v1669_v22, %v1655_v14  ;;  %v1471_v30 = vadd.f32 %v2143_v24, %v2572_v54 }
 0x238   : > { %v2145_v31 = vpop.f32.mrf.mxu1  ;;  %v1694_v38 = vmul.f32 %v1656_v29, %v1468_v13 }
 0x239   : > { %v1708_v32 = vadd.f32 %v1707_v27, %v1693_v25  ;;  %v2056_v33 = vpack.c.bf16 %v1471_v30, %v1468_v13  ;;  %v1657_v34 = vmul.f32 0.0, %v1471_v30  ;;  %v2146_v35 = vadd.f32 %v2145_v31, %v2144_v26 }
 0x23a   : > { %v2147_v36 = vpop.f32.mrf.mxu1  ;;  %v1671_v37 = vadd.f32 %v1670_v28, %v1656_v29 }
 0x23b   : > { %2068 = vst [vmem:[%s2582_s15 + $0x30] sm:$0xff] %v2056_v33   ;;  %v1476_v39 = vadd.f32 %v2146_v35, %v2572_v54  ;;  %v1709_v41 = vadd.f32 %v1708_v32, %v1694_v38  ;;  %v1695_v43 = vmul.f32 %v1657_v34, %v1471_v30 }
 0x23c   : > { %v2148_v40 = vpop.f32.mrf.mxu1  ;;  %v1672_v42 = vadd.f32 %v1671_v37, %v1657_v34 }
 0x23d   : > { %v2149_v44 = vadd.f32 %v2148_v40, %v2147_v36  ;;  %v1658_v45 = vmul.f32 0.0, %v1476_v39  ;;  %v1710_v48 = vadd.f32 %v1709_v41, %v1695_v43 }
 0x23f   : > { %v1479_v46 = vadd.f32 %v2149_v44, %v2572_v54  ;;  %v1696_v47 = vmul.f32 %v1658_v45, %v1476_v39  ;;  %v1673_v49 = vadd.f32 %v1672_v42, %v1658_v45 }
 0x241   : > { %v2061_v50 = vpack.c.bf16 %v1479_v46, %v1476_v39  ;;  %v1659_v51 = vmul.f32 0.0, %v1479_v46  ;;  %v1711_v52 = vadd.f32 %v1710_v48, %v1696_v47 }
 0x243   : > { %2069 = vst [vmem:[%s2582_s15 + $0x38] sm:$0xff] %v2061_v50   ;;  %v1674_v53 = vadd.f32 %v1673_v49, %v1659_v51  ;;  %v1697_v55 = vmul.f32 %v1659_v51, %v1479_v46 }
 0x245   : > { %v1675_v56 = vrot.slane %v1674_v53, 4  ;;  %v1712_v57 = vadd.f32 %v1711_v52, %v1697_v55 }
 0x247   : > { %v1676_v60 = vadd.f32 %v1675_v56, %v1674_v53  ;;  %v1713_v61 = vrot.slane %v1712_v57, 4 }
 0x249   : > { %v1677_v62 = vrot.slane %v1676_v60, 2  ;;  %v1714_v63 = vadd.f32 %v1713_v61, %v1712_v57 }
 0x24b   : > { %v1678_v0 = vadd.f32 %v1677_v62, %v1676_v60  ;;  %v1715_v1 = vrot.slane %v1714_v63, 2 }
 0x24d   : > { %v1679_v54 = vrot.slane %v1678_v0, 1  ;;  %v1716_v2 = vadd.f32 %v1715_v1, %v1714_v63 }
 0x24f   : > { %v1680_v58 = vadd.f32 %v1679_v54, %v1678_v0  ;;  %v1717_v3 = vrot.slane %v1716_v2, 1 }
 0x251   : > { %1681 = vst [vmem:[%s453_s18] sm:$0x1] %v1680_v58  ;;  %v1718_v4 = vadd.f32 %v1717_v3, %v1716_v2 }
 0x253   : > { %1719 = vst [vmem:[%s453_s18 + $0x1] sm:$0x1] %v1718_v4 }
 0x254 PF: > { %s19_s3 = sadd.s32 1, %s2344_s3   ;;  %s2631_s27 = smov %s2340_s28 }
 0x255   : > { %p16_p5 = scmp.ge.s32.totalorder %s19_s3, 4   ;;  %s2632_s28 = smov %s2634_s4 }
 0x257   :  { %18 = sbr.rel (!%p16_p5) target bundleno = 2 (0x2), region = 104 }

// kernel: gnn_forward.5
= control target key start
LH: loop header
LB: loop body
LE: loop exit
PB: predicated region body
PF: predicated region fallthrough
CT: control target
= control target key end

     0   :  { %s2671_s27 = smov 0   ;;  %s2673_s28 = smov 0   ;;  %s3002_s0 = inlined_call_operand.vmem [shape: bf16[2,128,128], index: 0, kind: input, shape index: {}]   ;;  %s3003_s1 = inlined_call_operand.vmem [shape: bf16[2,128,128], index: 1, kind: input, shape index: {}, may-alias: {1,2}]   ;;  %s3004_s2 = inlined_call_operand.vmem [shape: bf16[2,128,128], index: 2, kind: input, shape index: {}, may-alias: {1,2}]   ;;  %s3005_s3 = inlined_call_operand.vmem [shape: f32[1,128], index: 3, kind: input, shape index: {}]   ;;  %s3006_s4 = inlined_call_operand.vmem [shape: f32[1,128], index: 4, kind: input, shape index: {}]   ;;  %s3007_s5 = inlined_call_operand.vmem [shape: bf16[256,128], index: 5, kind: input, shape index: {}]   ;;  %s3008_s6 = inlined_call_operand.vmem [shape: f32[1,128], index: 6, kind: input, shape index: {}]   ;;  %s3009_s7 = inlined_call_operand.vmem [shape: bf16[2,128,128], index: 7, kind: output, shape index: {0}]   ;;  %s3010_s8 = inlined_call_operand.vmem [shape: f32[2,1,2,128], index: 8, kind: output, shape index: {1}]  }
   0x1   :  { %s2675_s29 = smov 0  }
   0x2 LB: > { %s38_s30 = sadd.s32 1, %s2618_s28  ;;  %p2074_p0 = scmp.ge.s32.totalorder %s2622_s29, 1  ;;  %s2622_s29 = sphi %s2675_s29, %s19_s29   ;;  %s2618_s28 = sphi %s2673_s28, %s3012_s28   ;;  %s2614_s27 = sphi %s2671_s27, %s3011_s27  }
   0x3   : > { %p40_p1 = scmp.ge.s32.totalorder %s38_s30, 2  ;;  %p334_p2 = scmp.lt.s32.totalorder %s2622_s29, 3 }
   0x5   : > { %s3014_s30 = smov (%p40_p1, %s38_s30), 0  ;;  %p335_p3 = pnand %p2074_p0, %p334_p2 }
   0x6   : > { %p405_p4 = scmp.lt.s32.totalorder (!%p335_p3), %s2614_s27, 1 }
   0x7   : > { %338 = sbr.rel (%p335_p3) target bundleno = 596 (0x254), region = 48 }
   0xc   : > { %vm594_vm0 = vcmask 7168   ;;  %s3016_s27 = smov (!%p405_p4, %s2614_s27), 1  ;;  %v2624_v0 = vmov 0.0   ;;  %v2742_v10 = vld [vmem:[%s3005_s3] ss:$0 sm:$0xff] }
   0xd   : > { %599 = vst.msk [vmem:[#allocation3 + $0x20] sm:$0xff] %vm594_vm0, %v2624_v0  ;;  %595 = vst.msk [vmem:[#allocation3] sm:$0xff] %vm594_vm0, %v2624_v0  ;;  %s2708_s9 = sshll.u32 %s3016_s27, 6  ;;  %v2749_v13 = vld [vmem:[%s3006_s4] ss:$0 sm:$0xff] }
   0xe   : > { %596 = vst.msk [vmem:[#allocation3 + $0x8] sm:$0xff] %vm594_vm0, %v2624_v0  ;;  %597 = vst.msk [vmem:[#allocation3 + $0x10] sm:$0xff] %vm594_vm0, %v2624_v0  ;;  %s2714_s12 = scalar_lea.vmem %s3002_s0, %s2708_s9  ;;  %s2726_s15 = scalar_lea.vmem %s3003_s1, %s2708_s9 }
   0xf   : > { %598 = vst.msk [vmem:[#allocation3 + $0x18] sm:$0xff] %vm594_vm0, %v2624_v0  ;;  %600 = vst.msk [vmem:[#allocation3 + $0x28] sm:$0xff] %vm594_vm0, %v2624_v0  ;;  %v2717_v1 = vld [vmem:[%s2714_s12 + $0x10] sm:$0xff]   ;;  %v2720_v2 = vld [vmem:[%s2714_s12] sm:$0xff]   ;;  %s2848_s19 = scalar_lea.vmem %s3004_s2, %s2708_s9  ;;  %s2962_s25 = scalar_lea.vmem %s3009_s7, %s2708_s9 }
  0x10   : > { %601 = vst.msk [vmem:[#allocation3 + $0x30] sm:$0xff] %vm594_vm0, %v2624_v0  ;;  %602 = vst.msk [vmem:[#allocation3 + $0x38] sm:$0xff] %vm594_vm0, %v2624_v0  ;;  %v998_v3 = vunpack.c.l.bf16 %v2717_v1  ;;  %v994_v4 = vunpack.c.l.bf16 %v2720_v2  ;;  %v999_v5 = vunpack.c.h.bf16 %v2717_v1  ;;  %v995_v6 = vunpack.c.h.bf16 %v2720_v2  ;;  %v2733_v7 = vld [vmem:[%s2714_s12 + $0x18] sm:$0xff]   ;;  %v2736_v8 = vld [vmem:[%s2714_s12 + $0x8] sm:$0xff]   ;;  %2452 = vmatprep.mubr.bf16.mxu0 %v2720_v2  ;;  %s2083_s9 = sshll.u32 %s3016_s27, 1 }
  0x11   : > { %603 = vst.msk [vmem:[#allocation3 + $0x40] sm:$0xff] %vm594_vm0, %v2624_v0  ;;  %604 = vst.msk [vmem:[#allocation3 + $0x48] sm:$0xff] %vm594_vm0, %v2624_v0  ;;  %v2341_v9 = vld [vmem:[%s2726_s15 + $0x38] sm:$0xff]   ;;  %v2340_v11 = vld [vmem:[%s2726_s15 + $0x30] sm:$0xff]   ;;  %v1001_v15 = vunpack.c.h.bf16 %v2733_v7  ;;  %v997_v16 = vunpack.c.h.bf16 %v2736_v8  ;;  %v1000_v17 = vunpack.c.l.bf16 %v2733_v7  ;;  %v996_v37 = vunpack.c.l.bf16 %v2736_v8  ;;  %s453_s11 = scalar_lea.vmem %s3010_s8, %s2083_s9 }
  0x12   : > { %605 = vst.msk [vmem:[#allocation3 + $0x50] sm:$0xff] %vm594_vm0, %v2624_v0  ;;  %606 = vst.msk [vmem:[#allocation3 + $0x58] sm:$0xff] %vm594_vm0, %v2624_v0  ;;  %1018 = vadd.xlane.f32.xlu0 %v998_v3  ;;  %1010 = vadd.xlane.f32.xlu1 %v994_v4  ;;  %v2339_v12 = vld [vmem:[%s2726_s15 + $0x28] sm:$0xff]   ;;  %v2338_v14 = vld [vmem:[%s2726_s15 + $0x20] sm:$0xff]   ;;  %v2261_v18 = vunpack.c.l.bf16 %v2341_v9  ;;  %v2262_v19 = vunpack.c.h.bf16 %v2341_v9  ;;  %v2257_v20 = vunpack.c.l.bf16 %v2340_v11  ;;  %v2258_v21 = vunpack.c.h.bf16 %v2340_v11 }
  0x13   : > { %607 = vst.msk [vmem:[#allocation3 + $0x60] sm:$0xff] %vm594_vm0, %v2624_v0  ;;  %608 = vst.msk [vmem:[#allocation3 + $0x68] sm:$0xff] %vm594_vm0, %v2624_v0  ;;  %v2253_v22 = vunpack.c.l.bf16 %v2339_v12  ;;  %v2337_v23 = vld [vmem:[%s2726_s15 + $0x18] sm:$0xff]   ;;  %v2757_v24 = vld [vmem:[%s2714_s12 + $0x20] sm:$0xff]   ;;  %v2254_v26 = vunpack.c.h.bf16 %v2339_v12  ;;  %v2249_v27 = vunpack.c.l.bf16 %v2338_v14  ;;  %v2250_v28 = vunpack.c.h.bf16 %v2338_v14 }
  0x14   : > { %609 = vst.msk [vmem:[#allocation3 + $0x70] sm:$0xff] %vm594_vm0, %v2624_v0  ;;  %610 = vst.msk [vmem:[#allocation3 + $0x78] sm:$0xff] %vm594_vm0, %v2624_v0  ;;  %v525_v25 = vmul.f32 %v2261_v18, %v2742_v10  ;;  %v526_v29 = vmul.f32 %v2262_v19, %v2742_v10  ;;  %v523_v30 = vmul.f32 %v2257_v20, %v2742_v10  ;;  %v2245_v44 = vunpack.c.l.bf16 %v2337_v23  ;;  %v2336_v49 = vld [vmem:[%s2726_s15 + $0x10] sm:$0xff]   ;;  %v2780_v54 = vld [vmem:[%s2714_s12 + $0x28] sm:$0xff]  }
  0x15   : > { %v524_v31 = vmul.f32 %v2258_v21, %v2742_v10  ;;  %v521_v32 = vmul.f32 %v2253_v22, %v2742_v10  ;;  %v522_v34 = vmul.f32 %v2254_v26, %v2742_v10  ;;  %v519_v35 = vmul.f32 %v2249_v27, %v2742_v10  ;;  %v2335_v59 = vld [vmem:[%s2726_s15 + $0x8] sm:$0xff]   ;;  %v2232_v14 = vld [vmem:[%s2726_s15] sm:$0xff]  }
  0x16   : > { %1020 = vadd.xlane.f32.xlu0 %v999_v5  ;;  %1012 = vadd.xlane.f32.xlu1 %v995_v6  ;;  %v548_v33 = vadd.f32 %v2749_v13, %v525_v25  ;;  %v520_v36 = vmul.f32 %v2250_v28, %v2742_v10  ;;  %v549_v38 = vadd.f32 %v2749_v13, %v526_v29  ;;  %v1003_v45 = vunpack.c.h.bf16 %v2757_v24  ;;  %v2788_v5 = vld [vmem:[%s2714_s12 + $0x30] sm:$0xff]  }
  0x17   : > { %v546_v39 = vadd.f32 %v2749_v13, %v523_v30  ;;  %v547_v40 = vadd.f32 %v2749_v13, %v524_v31  ;;  %v544_v42 = vadd.f32 %v2749_v13, %v521_v32  ;;  %v545_v43 = vadd.f32 %v2749_v13, %v522_v34 }
  0x18   : > { %v564_v41 = vmax.f32 %v548_v33, 0.0  ;;  %v565_v46 = vmax.f32 %v549_v38, 0.0  ;;  %v1002_v50 = vunpack.c.l.bf16 %v2757_v24  ;;  %v542_v51 = vadd.f32 %v2749_v13, %v519_v35 }
  0x19   : > { %v562_v47 = vmax.f32 %v546_v39, 0.0  ;;  %v563_v48 = vmax.f32 %v547_v40, 0.0  ;;  %v543_v52 = vadd.f32 %v2749_v13, %v520_v36  ;;  %v2246_v53 = vunpack.c.h.bf16 %v2337_v23  ;;  %v471_v23 = vld [vmem:[%s2714_s12 + $0x38] sm:$0xff]  }
  0x1a   : > { %1024 = vadd.xlane.f32.xlu1 %v1001_v15  ;;  %1022 = vadd.xlane.f32.xlu0 %v1000_v17  ;;  %v573_v55 = vpack.c.bf16 %v565_v46, %v564_v41  ;;  %v560_v57 = vmax.f32 %v544_v42, 0.0  ;;  %v561_v58 = vmax.f32 %v545_v43, 0.0  ;;  %v517_v60 = vmul.f32 %v2245_v44, %v2742_v10 }
  0x1b   : > { %v572_v56 = vpack.c.bf16 %v563_v48, %v562_v47  ;;  %v518_v61 = vmul.f32 %v2246_v53, %v2742_v10  ;;  %v2241_v62 = vunpack.c.l.bf16 %v2336_v49  ;;  %v2242_v63 = vunpack.c.h.bf16 %v2336_v49  ;;  %v982_v53 = vld [vmem:[#allocation3 + $0x20] sm:$0xff] }
  0x1c   : > { %2436 = vmatprep.subr.bf16.mxu0 %v573_v55  ;;  %v1005_v0 = vunpack.c.h.bf16 %v2780_v54  ;;  %v1004_v3 = vunpack.c.l.bf16 %v2780_v54  ;;  %v2237_v4 = vunpack.c.l.bf16 %v2335_v59  ;;  %v558_v6 = vmax.f32 %v542_v51, 0.0  ;;  %v2521_v51 = vld [vmem:[%s3007_s5 + $0x38] sm:$0xff]  }
  0x1d   : > { %2437 = vmatpush3.bf16.msra.mxu0 %v573_v55  ;;  %v515_v9 = vmul.f32 %v2241_v62, %v2742_v10  ;;  %v516_v11 = vmul.f32 %v2242_v63, %v2742_v10  ;;  %v2238_v12 = vunpack.c.h.bf16 %v2335_v59  ;;  %v571_v15 = vpack.c.bf16 %v561_v58, %v560_v57  ;;  %v983_v59 = vld [vmem:[#allocation3 + $0x28] sm:$0xff] }
  0x1e   : > { %1016 = vadd.xlane.f32.xlu1 %v997_v16  ;;  %1014 = vadd.xlane.f32.xlu0 %v996_v37  ;;  %v559_v16 = vmax.f32 %v543_v52, 0.0  ;;  %v540_v17 = vadd.f32 %v2749_v13, %v517_v60  ;;  %v541_v18 = vadd.f32 %v2749_v13, %v518_v61  ;;  %v1007_v19 = vunpack.c.h.bf16 %v2788_v5  ;;  %v2526_v52 = vld [vmem:[%s3007_s5 + $0x60] sm:$0xff]   ;;  %v979_v60 = vld [vmem:[#allocation3 + $0x8] sm:$0xff] }
  0x1f   : > { %2438 = vmatprep.subr.bf16.mxu0 %v572_v56  ;;  %v1006_v20 = vunpack.c.l.bf16 %v2788_v5  ;;  %v513_v21 = vmul.f32 %v2237_v4, %v2742_v10  ;;  %v2233_v22 = vunpack.c.l.bf16 %v2232_v14  ;;  %v538_v25 = vadd.f32 %v2749_v13, %v515_v9  ;;  %v984_v4 = vld [vmem:[#allocation3 + $0x30] sm:$0xff] }
  0x20   : > { %v539_v26 = vadd.f32 %v2749_v13, %v516_v11  ;;  %v514_v27 = vmul.f32 %v2238_v12, %v2742_v10  ;;  %v2234_v28 = vunpack.c.h.bf16 %v2232_v14  ;;  %v570_v29 = vpack.c.bf16 %v559_v16, %v558_v6  ;;  %v981_v12 = vld [vmem:[#allocation3 + $0x18] sm:$0xff]  ;;  %v980_v14 = vld [vmem:[#allocation3 + $0x10] sm:$0xff] }
  0x21   : > { %2439 = vmatpush3.bf16.msra.mxu0 %v572_v56  ;;  %v556_v30 = vmax.f32 %v540_v17, 0.0  ;;  %v557_v31 = vmax.f32 %v541_v18, 0.0  ;;  %v1009_v32 = vunpack.c.h.bf16 %v471_v23  ;;  %v1008_v33 = vunpack.c.l.bf16 %v471_v23 }
  0x22   : > { %1028 = vadd.xlane.f32.xlu1 %v1003_v45  ;;  %1026 = vadd.xlane.f32.xlu0 %v1002_v50  ;;  %v536_v34 = vadd.f32 %v2749_v13, %v513_v21  ;;  %v511_v35 = vmul.f32 %v2233_v22, %v2742_v10  ;;  %v554_v36 = vmax.f32 %v538_v25, 0.0  ;;  %v555_v37 = vmax.f32 %v539_v26, 0.0  ;;  %v2520_v50 = vld [vmem:[%s3007_s5 + $0x78] sm:$0xff]   ;;  %v987_v22 = vld [vmem:[#allocation3 + $0x48] sm:$0xff]  ;;  %v986_v25 = vld [vmem:[#allocation3 + $0x40] sm:$0xff] }
  0x23   : > { %2440 = vmatprep.subr.bf16.mxu0 %v571_v15  ;;  %v537_v38 = vadd.f32 %v2749_v13, %v514_v27  ;;  %v512_v39 = vmul.f32 %v2234_v28, %v2742_v10  ;;  %v569_v40 = vpack.c.bf16 %v557_v31, %v556_v30  ;;  %v2625_v48 = vmov 0   ;;  %2468 = vmatprep.subr.bf16.mxu1 %v2520_v50  ;;  %v2343_v31 = vld [vmem:[%s2848_s19 + $0x10] sm:$0xff]  }
  0x24   : > { %v534_v2 = vadd.f32 %v2749_v13, %v511_v35  ;;  %v568_v41 = vpack.c.bf16 %v555_v37, %v554_v36  ;;  %v552_v42 = vmax.f32 %v536_v34, 0.0  ;;  %2510 = vset.pattern.permute.xlu0 %v2625_v48  ;;  %2511 = vset.pattern.permute.xlu1 %v2625_v48  ;;  %v2273_v34 = vunpack.c.l.bf16 %v2343_v31  ;;  %v989_v35 = vld [vmem:[#allocation3 + $0x58] sm:$0xff]  ;;  %v988_v36 = vld [vmem:[#allocation3 + $0x50] sm:$0xff] }
  0x25   : > { %2441 = vmatpush3.bf16.msra.mxu0 %v571_v15  ;;  %v553_v43 = vmax.f32 %v537_v38, 0.0  ;;  %v535_v44 = vadd.f32 %v2749_v13, %v512_v39  ;;  %2476 = vmatpush3.bf16.msra.mxu1 %v2521_v51 }
  0x26   : > { %1032 = vadd.xlane.f32.xlu1 %v1005_v0  ;;  %1030 = vadd.xlane.f32.xlu0 %v1004_v3  ;;  %v550_v46 = vmax.f32 %v534_v2, 0.0  ;;  %v985_v3 = vld [vmem:[#allocation3 + $0x38] sm:$0xff]  ;;  %v654_v38 = vmul.f32 %v2273_v34, %v2742_v10 }
  0x27   : > { %2442 = vmatprep.subr.bf16.mxu0 %v570_v29  ;;  %v567_v45 = vpack.c.bf16 %v553_v43, %v552_v42  ;;  %v551_v47 = vmax.f32 %v535_v44, 0.0  ;;  %v2274_v44 = vunpack.c.h.bf16 %v2343_v31 }
  0x29   : > { %2443 = vmatpush3.bf16.msra.mxu0 %v570_v29  ;;  %v566_v49 = vpack.c.bf16 %v551_v47, %v550_v46  ;;  %v990_v46 = vld [vmem:[#allocation3 + $0x60] sm:$0xff]  ;;  %v677_v47 = vadd.f32 %v2749_v13, %v654_v38 }
  0x2a   : > { %1036 = vadd.xlane.f32.xlu1 %v1007_v19  ;;  %1034 = vadd.xlane.f32.xlu0 %v1006_v20  ;;  %v2534_v38 = vld [vmem:[%s3007_s5 + $0x40] sm:$0xff]  }
  0x2b   : > { %2444 = vmatprep.subr.bf16.mxu0 %v569_v40 }
  0x2d   : > { %2445 = vmatpush3.bf16.msra.mxu0 %v569_v40 }
  0x2e   : > { %1040 = vadd.xlane.f32.xlu1 %v1009_v32  ;;  %1038 = vadd.xlane.f32.xlu0 %v1008_v33 }
  0x2f   : > { %2446 = vmatprep.subr.bf16.mxu0 %v568_v41 }
  0x31   : > { %2447 = vmatpush3.bf16.msra.mxu0 %v568_v41  ;;  %v2527_v41 = vld [vmem:[%s3007_s5 + $0x20] sm:$0xff]  }
  0x32   : > { %2448 = vmatprep.subr.bf16.mxu0 %v567_v45 }
  0x35   : > { %2449 = vmatpush3.bf16.msra.mxu0 %v567_v45  ;;  %v991_v45 = vld [vmem:[#allocation3 + $0x68] sm:$0xff] }
  0x36   : > { %2450 = vmatprep.subr.bf16.mxu0 %v566_v49 }
  0x39   : > { %2451 = vmatpush3.bf16.msra.mxu0 %v566_v49  ;;  %v2528_v49 = vld [vmem:[%s3007_s5 + $0x58] sm:$0xff]  }
  0x3a   : > { %2372 = vmatprep.subr.bf16.mxu0 %v2520_v50  ;;  %v655_v50 = vmul.f32 %v2274_v44, %v2742_v10  ;;  %v2903_v44 = vld [vmem:[%s2848_s19 + $0x28] sm:$0xff]  }
  0x3c   : > { %2453 = vmatmul.mubr.bf16.vlgmr.msra.gmra.mxu0 %v2736_v8  ;;  %v2524_v8 = vld [vmem:[%s3007_s5 + $0x68] sm:$0xff]  }
  0x3d   : > { %2456 = vmatprep.mubr.bf16.mxu0 %v2717_v1  ;;  %2373 = vmatpush3.bf16.msra.mxu0 %v2521_v51  ;;  %v2522_v1 = vld [vmem:[%s3007_s5 + $0x70] sm:$0xff]  }
  0x3e   : > { %2469 = vmatprep.subr.bf16.mxu1 %v2522_v1  ;;  %2374 = vmatprep.subr.bf16.mxu0 %v2522_v1 }
  0x44   : > { %2457 = vmatmul.mubr.bf16.gmra.mxu0 %v2733_v7  ;;  %v2523_v7 = vld [vmem:[%s3007_s5 + $0x30] sm:$0xff]  }
  0x45   : > { %2460 = vmatprep.mubr.bf16.mxu0 %v2757_v24  ;;  %2477 = vmatpush3.bf16.msra.mxu1 %v2523_v7  ;;  %v2525_v24 = vld [vmem:[%s3007_s5 + $0x28] sm:$0xff]  }
  0x46   : > { %2375 = vmatpush3.bf16.msra.mxu0 %v2523_v7  ;;  %2470 = vmatprep.subr.bf16.mxu1 %v2524_v8 }
  0x47   : > { %2376 = vmatprep.subr.bf16.mxu0 %v2524_v8  ;;  %v2529_v8 = vld [vmem:[%s3007_s5 + $0x18] sm:$0xff]  }
  0x49   : > { %2478 = vmatpush3.bf16.msra.mxu1 %v2525_v24 }
  0x4a   : > { %2377 = vmatpush3.bf16.msra.mxu0 %v2525_v24  ;;  %2471 = vmatprep.subr.bf16.mxu1 %v2526_v52  ;;  %v693_v24 = vmax.f32 %v677_v47, 0.0 }
  0x4b   : > { %2378 = vmatprep.subr.bf16.mxu0 %v2526_v52  ;;  %v2264_v52 = vld [vmem:[%s2848_s19] sm:$0xff]  }
  0x4c   : > { %2461 = vmatmul.mubr.bf16.gmra.mxu0 %v2780_v54  ;;  %v978_v54 = vld [vmem:[#allocation3] sm:$0xff] }
  0x4d   : > { %2464 = vmatprep.mubr.bf16.mxu0 %v2788_v5  ;;  %2479 = vmatpush3.bf16.msra.mxu1 %v2527_v41 }
  0x4e   : > { %2379 = vmatpush3.bf16.msra.mxu0 %v2527_v41  ;;  %2472 = vmatprep.subr.bf16.mxu1 %v2528_v49 }
  0x4f   : > { %2380 = vmatprep.subr.bf16.mxu0 %v2528_v49 }
  0x51   : > { %2480 = vmatpush3.bf16.msra.mxu1 %v2529_v8 }
  0x52   : > { %2381 = vmatpush3.bf16.msra.mxu0 %v2529_v8 }
  0x54   : > { %2465 = vmatmul.mubr.bf16.gmra.mxu0 %v471_v23 }
  0x9b   : > { %v1019_v55 = vpop.xlane.xlu0 %1018  ;;  %v1011_v56 = vpop.xlane.xlu1 %1010 }
  0x9c   : > { %v1046_v57 = vadd.f32 %v1019_v55, %v982_v53  ;;  %v1042_v58 = vadd.f32 %v1011_v56, %v978_v54  ;;  %v678_v55 = vadd.f32 %v2749_v13, %v655_v50  ;;  %v2286_v50 = vunpack.c.h.bf16 %v2903_v44 }
  0x9e   : > { %1063 = vst.msk [vmem:[#allocation3 + $0x20] sm:$0xff] %vm594_vm0, %v1046_v57  ;;  %1059 = vst.msk [vmem:[#allocation3] sm:$0xff] %vm594_vm0, %v1042_v58  ;;  %v993_v57 = vld [vmem:[#allocation3 + $0x78] sm:$0xff] }
  0x9f   : > { %v1021_v61 = vpop.xlane.xlu0 %1020  ;;  %v1013_v62 = vpop.xlane.xlu1 %1012 }
  0xa0   : > { %v1047_v63 = vadd.f32 %v1021_v61, %v983_v59  ;;  %v1043_v0 = vadd.f32 %v1013_v62, %v979_v60  ;;  %v992_v59 = vld [vmem:[#allocation3 + $0x70] sm:$0xff]  ;;  %v2187_v60 = vpack.c.bf16 %v693_v24, %v693_v24  ;;  %v2265_v61 = vunpack.c.l.bf16 %v2264_v52 }
  0xa2   : > { %1064 = vst.msk [vmem:[#allocation3 + $0x28] sm:$0xff] %vm594_vm0, %v1047_v63  ;;  %1060 = vst.msk [vmem:[#allocation3 + $0x8] sm:$0xff] %vm594_vm0, %v1043_v0  ;;  %v2530_v0 = vld [vmem:[%s3007_s5 + $0x50] sm:$0xff]  }
  0xa3   : > { %v1025_v5 = vpop.xlane.xlu1 %1024  ;;  %v1023_v6 = vpop.xlane.xlu0 %1022  ;;  %773 = vst [vmem:[#allocation4 + $0x24] sm:$0xf] %v2187_v60  ;;  %2473 = vmatprep.subr.bf16.mxu1 %v2530_v0  ;;  %2382 = vmatprep.subr.bf16.mxu0 %v2530_v0 }
  0xa4   : > { %v1049_v9 = vadd.f32 %v1025_v5, %v985_v3  ;;  %v1048_v11 = vadd.f32 %v1023_v6, %v984_v4  ;;  %v694_v3 = vmax.f32 %v678_v55, 0.0  ;;  %v661_v55 = vmul.f32 %v2286_v50, %v2742_v10 }
  0xa5   : > { %v1082_v15 = vld [vmem:[#allocation3 + $0x20] sm:$0xff] }
  0xa6   : > { %1066 = vst.msk [vmem:[#allocation3 + $0x38] sm:$0xff] %vm594_vm0, %v1049_v9  ;;  %1065 = vst.msk [vmem:[#allocation3 + $0x30] sm:$0xff] %vm594_vm0, %v1048_v11  ;;  %v1098_v16 = vmax.f32 %v1082_v15, 1.0  ;;  %v1078_v19 = vld [vmem:[#allocation3] sm:$0xff]  ;;  %v2531_v9 = vld [vmem:[%s3007_s5 + $0x10] sm:$0xff]   ;;  %v650_v11 = vmul.f32 %v2265_v61, %v2742_v10  ;;  %v2188_v15 = vpack.c.bf16 %v694_v3, %v694_v3 }
  0xa7   : > { %v1017_v17 = vpop.xlane.xlu1 %1016  ;;  %v1015_v18 = vpop.xlane.xlu0 %1014  ;;  %v1094_v27 = vmax.f32 %v1078_v19, 1.0  ;;  %2481 = vmatpush3.bf16.msra.mxu1 %v2531_v9  ;;  %2383 = vmatpush3.bf16.msra.mxu0 %v2531_v9 }
  0xa8   : > { %v1045_v20 = vadd.f32 %v1017_v17, %v981_v12  ;;  %v1044_v21 = vadd.f32 %v1015_v18, %v980_v14  ;;  %2568 = vrcp.f32 %v1098_v16  ;;  %v2266_v18 = vunpack.c.h.bf16 %v2264_v52  ;;  %774 = vst [vmem:[#allocation4 + $0x2c] sm:$0xf] %v2188_v15 }
  0xa9   : > { %v1083_v23 = vld [vmem:[#allocation3 + $0x28] sm:$0xff]  ;;  %v673_v19 = vadd.f32 %v2749_v13, %v650_v11 }
  0xaa   : > { %1062 = vst.msk [vmem:[#allocation3 + $0x18] sm:$0xff] %vm594_vm0, %v1045_v20  ;;  %1061 = vst.msk [vmem:[#allocation3 + $0x10] sm:$0xff] %vm594_vm0, %v1044_v21  ;;  %v1099_v26 = vmax.f32 %v1083_v23, 1.0  ;;  %v1079_v30 = vld [vmem:[#allocation3 + $0x8] sm:$0xff] }
  0xab   : > { %v1029_v28 = vpop.xlane.xlu1 %1028  ;;  %v1027_v29 = vpop.xlane.xlu0 %1026  ;;  %v1095_v37 = vmax.f32 %v1079_v30, 1.0  ;;  %v2532_v23 = vld [vmem:[%s3007_s5 + $0x48] sm:$0xff]   ;;  %v2890_v30 = vld [vmem:[%s2848_s19 + $0x20] sm:$0xff]  }
  0xac   : > { %v1051_v32 = vadd.f32 %v1029_v28, %v987_v22  ;;  %2570 = vrcp.f32 %v1099_v26  ;;  %v1050_v33 = vadd.f32 %v1027_v29, %v986_v25  ;;  %v2533_v26 = vld [vmem:[%s3007_s5 + $0x8] sm:$0xff]   ;;  %v689_v28 = vmax.f32 %v673_v19, 0.0  ;;  %v2344_v29 = vld [vmem:[%s2848_s19 + $0x18] sm:$0xff]   ;;  %2474 = vmatprep.subr.bf16.mxu1 %v2532_v23  ;;  %2384 = vmatprep.subr.bf16.mxu0 %v2532_v23 }
  0xad   : > { %2572 = vrcp.f32 %v1094_v27  ;;  %v1084_v2 = vld [vmem:[#allocation3 + $0x30] sm:$0xff]  ;;  %v1085_v7 = vld [vmem:[#allocation3 + $0x38] sm:$0xff]  ;;  %v651_v27 = vmul.f32 %v2266_v18, %v2742_v10  ;;  %v2277_v31 = vunpack.c.l.bf16 %v2344_v29  ;;  %2482 = vmatpush3.bf16.msra.mxu1 %v2533_v26  ;;  %2385 = vmatpush3.bf16.msra.mxu0 %v2533_v26 }
  0xae   : > { %1068 = vst.msk [vmem:[#allocation3 + $0x48] sm:$0xff] %vm594_vm0, %v1051_v32  ;;  %1067 = vst.msk [vmem:[#allocation3 + $0x40] sm:$0xff] %vm594_vm0, %v1050_v33  ;;  %2574 = vrcp.f32 %v1095_v37  ;;  %v1100_v48 = vmax.f32 %v1084_v2, 1.0  ;;  %v1101_v63 = vmax.f32 %v1085_v7, 1.0  ;;  %v2282_v32 = vunpack.c.h.bf16 %v2890_v30  ;;  %2475 = vmatprep.subr.bf16.mxu1 %v2534_v38  ;;  %2386 = vmatprep.subr.bf16.mxu0 %v2534_v38 }
  0xaf   : > { %v1033_v39 = vpop.xlane.xlu1 %1032  ;;  %v1031_v40 = vpop.xlane.xlu0 %1030 }
  0xb0   : > { %v1053_v42 = vadd.f32 %v1033_v39, %v989_v35  ;;  %v1052_v43 = vadd.f32 %v1031_v40, %v988_v36  ;;  %2576 = vrcp.f32 %v1100_v48  ;;  %v674_v35 = vadd.f32 %v2749_v13, %v651_v27 }
  0xb1   : > { %v1080_v6 = vld [vmem:[#allocation3 + $0x10] sm:$0xff]  ;;  %v1081_v22 = vld [vmem:[#allocation3 + $0x18] sm:$0xff]  ;;  %v2183_v36 = vpack.c.bf16 %v689_v28, %v689_v28  ;;  %v656_v39 = vmul.f32 %v2277_v31, %v2742_v10  ;;  %v659_v40 = vmul.f32 %v2282_v32, %v2742_v10  ;;  %v2281_v32 = vunpack.c.l.bf16 %v2890_v30 }
  0xb2   : > { %1070 = vst.msk [vmem:[#allocation3 + $0x58] sm:$0xff] %vm594_vm0, %v1053_v42  ;;  %1069 = vst.msk [vmem:[#allocation3 + $0x50] sm:$0xff] %vm594_vm0, %v1052_v43  ;;  %v1096_v21 = vmax.f32 %v1080_v6, 1.0  ;;  %v1097_v34 = vmax.f32 %v1081_v22, 1.0  ;;  %v2535_v42 = vld [vmem:[%s3007_s5] sm:$0xff]   ;;  %v690_v43 = vmax.f32 %v674_v35, 0.0  ;;  %v2285_v30 = vunpack.c.l.bf16 %v2903_v44 }
  0xb3   : > { %v1037_v51 = vpop.xlane.xlu1 %1036  ;;  %v1035_v1 = vpop.xlane.xlu0 %1034  ;;  %769 = vst [vmem:[#allocation4 + $0x4] sm:$0xf] %v2183_v36  ;;  %v682_v47 = vadd.f32 %v2749_v13, %v659_v40  ;;  %2483 = vmatpush3.bf16.msra.mxu1 %v2535_v42  ;;  %2387 = vmatpush3.bf16.msra.mxu0 %v2535_v42 }
  0xb4   : > { %v1055_v53 = vadd.f32 %v1037_v51, %v991_v45  ;;  %v1054_v54 = vadd.f32 %v1035_v1, %v990_v46  ;;  %v2278_v45 = vunpack.c.h.bf16 %v2344_v29  ;;  %v679_v46 = vadd.f32 %v2749_v13, %v656_v39 }
  0xb5   : > { %v2569_v56 = vpop.eup %2568  ;;  %v1087_v58 = vld [vmem:[#allocation3 + $0x48] sm:$0xff]  ;;  %v1086_v41 = vld [vmem:[#allocation3 + $0x40] sm:$0xff]  ;;  %v2184_v49 = vpack.c.bf16 %v690_v43, %v690_v43  ;;  %v658_v39 = vmul.f32 %v2281_v32, %v2742_v10 }
  0xb6   : > { %1072 = vst.msk [vmem:[#allocation3 + $0x68] sm:$0xff] %vm594_vm0, %v1055_v53  ;;  %1180 = vperm.xlu0 %2510, %v2569_v56   ;;  %1071 = vst.msk [vmem:[#allocation3 + $0x60] sm:$0xff] %vm594_vm0, %v1054_v54  ;;  %v1103_v62 = vmax.f32 %v1087_v58, 1.0  ;;  %v1102_v1 = vmax.f32 %v1086_v41, 1.0  ;;  %v657_v7 = vmul.f32 %v2278_v45, %v2742_v10  ;;  %v695_v8 = vmax.f32 %v679_v46, 0.0  ;;  %v2342_v53 = vld [vmem:[%s2848_s19 + $0x8] sm:$0xff]  }
  0xb7   : > { %v1041_v4 = vpop.xlane.xlu1 %1040  ;;  %v1039_v5 = vpop.xlane.xlu0 %1038  ;;  %770 = vst [vmem:[#allocation4 + $0xc] sm:$0xf] %v2184_v49  ;;  %v698_v54 = vmax.f32 %v682_v47, 0.0  ;;  %v2269_v58 = vunpack.c.l.bf16 %v2342_v53  ;;  %v681_v41 = vadd.f32 %v2749_v13, %v658_v39  ;;  %v660_v46 = vmul.f32 %v2285_v30, %v2742_v10 }
  0xb8   : > { %v1057_v12 = vadd.f32 %v1041_v4, %v993_v57  ;;  %2578 = vrcp.f32 %v1103_v62  ;;  %v1056_v14 = vadd.f32 %v1039_v5, %v992_v59  ;;  %v680_v56 = vadd.f32 %v2749_v13, %v657_v7  ;;  %v2913_v59 = vld [vmem:[%s2848_s19 + $0x30] sm:$0xff]  }
  0xb9   : > { %v2571_v16 = vpop.eup %2570  ;;  %v1089_v17 = vld [vmem:[#allocation3 + $0x58] sm:$0xff]  ;;  %2580 = vrcp.f32 %v1101_v63  ;;  %v1088_v52 = vld [vmem:[#allocation3 + $0x50] sm:$0xff]  ;;  %v2189_v57 = vpack.c.bf16 %v695_v8, %v695_v8  ;;  %v2192_v61 = vpack.c.bf16 %v698_v54, %v698_v54  ;;  %v684_v62 = vadd.f32 %v2749_v13, %v661_v55 }
  0xba   : > { %1074 = vst.msk [vmem:[#allocation3 + $0x78] sm:$0xff] %vm594_vm0, %v1057_v12  ;;  %1185 = vperm.xlu1 %2511, %v2571_v16   ;;  %1073 = vst.msk [vmem:[#allocation3 + $0x70] sm:$0xff] %vm594_vm0, %v1056_v14  ;;  %v1105_v20 = vmax.f32 %v1089_v17, 1.0  ;;  %v2573_v25 = vpop.eup %2572  ;;  %v2290_v63 = vunpack.c.h.bf16 %v2913_v59  ;;  %v1104_v0 = vmax.f32 %v1088_v52, 1.0  ;;  %v696_v3 = vmax.f32 %v680_v56, 0.0  ;;  %v2348_v16 = vld [vmem:[%s2848_s19 + $0x38] sm:$0xff]  }
  0xbb   : > { %v2575_v2 = vpop.eup %2574  ;;  %775 = vst [vmem:[#allocation4 + $0x34] sm:$0xf] %v2189_v57  ;;  %v652_v4 = vmul.f32 %v2269_v58, %v2742_v10  ;;  %778 = vst [vmem:[#allocation4 + $0x4c] sm:$0xf] %v2192_v61  ;;  %v700_v9 = vmax.f32 %v684_v62, 0.0  ;;  %v2270_v14 = vunpack.c.h.bf16 %v2342_v53  ;;  %v697_v45 = vmax.f32 %v681_v41, 0.0 }
  0xbc   : > { %2582 = vrcp.f32 %v1105_v20  ;;  %v663_v11 = vmul.f32 %v2290_v63, %v2742_v10  ;;  %v2190_v12 = vpack.c.bf16 %v696_v3, %v696_v3  ;;  %v2294_v20 = vunpack.c.h.bf16 %v2348_v16 }
  0xbd   : > { %v1091_v33 = vld [vmem:[#allocation3 + $0x68] sm:$0xff]  ;;  %2584 = vrcp.f32 %v1096_v21  ;;  %v2577_v24 = vpop.eup %2576  ;;  %v1090_v6 = vld [vmem:[#allocation3 + $0x60] sm:$0xff]  ;;  %v675_v15 = vadd.f32 %v2749_v13, %v652_v4  ;;  %v2194_v18 = vpack.c.bf16 %v700_v9, %v700_v9  ;;  %v653_v22 = vmul.f32 %v2270_v14, %v2742_v10 }
  0xbe   : > { %1160 = vperm.xlu1 %2511, %v2573_v25   ;;  %v1107_v37 = vmax.f32 %v1091_v33, 1.0  ;;  %v686_v19 = vadd.f32 %v2749_v13, %v663_v11  ;;  %v1106_v21 = vmax.f32 %v1090_v6, 1.0  ;;  %776 = vst [vmem:[#allocation4 + $0x3c] sm:$0xf] %v2190_v12  ;;  %v665_v28 = vmul.f32 %v2294_v20, %v2742_v10 }
  0xbf   : > { %v691_v23 = vmax.f32 %v675_v15, 0.0  ;;  %780 = vst [vmem:[#allocation4 + $0x5c] sm:$0xf] %v2194_v18  ;;  %v676_v29 = vadd.f32 %v2749_v13, %v653_v22  ;;  %v683_v49 = vadd.f32 %v2749_v13, %v660_v46  ;;  %v2289_v50 = vunpack.c.l.bf16 %v2913_v59  ;;  %v2541_v46 = vld [vmem:[#allocation4 + $0x4] ss:$8 sps:$4 sm:$0xff]  }
  0xc0   : > { %2586 = vrcp.f32 %v1107_v37  ;;  %v702_v27 = vmax.f32 %v686_v19, 0.0  ;;  %v688_v35 = vadd.f32 %v2749_v13, %v665_v28  ;;  %1597 = vmatprep.mubr.bf16.mxu0 %v2541_v46 }
  0xc1   : > { %2588 = vrcp.f32 %v1097_v34  ;;  %v1093_v48 = vld [vmem:[#allocation3 + $0x78] sm:$0xff]  ;;  %v1092_v26 = vld [vmem:[#allocation3 + $0x70] sm:$0xff]  ;;  %v2185_v31 = vpack.c.bf16 %v691_v23, %v691_v23  ;;  %v692_v38 = vmax.f32 %v676_v29, 0.0 }
  0xc2   : > { %1165 = vperm.xlu1 %2511, %v2575_v2   ;;  %v1109_v51 = vmax.f32 %v1093_v48, 1.0  ;;  %v2196_v34 = vpack.c.bf16 %v702_v27, %v702_v27  ;;  %v1108_v37 = vmax.f32 %v1092_v26, 1.0  ;;  %v704_v40 = vmax.f32 %v688_v35, 0.0 }
  0xc3   : > { %771 = vst [vmem:[#allocation4 + $0x14] sm:$0xf] %v2185_v31  ;;  %v2186_v2 = vpack.c.bf16 %v692_v38, %v692_v38  ;;  %v2191_v48 = vpack.c.bf16 %v697_v45, %v697_v45  ;;  %v2538_v31 = vld [vmem:[#allocation4 + $0x24] ss:$8 sps:$4 sm:$0xff]  }
  0xc4   : > { %2590 = vrcp.f32 %v1109_v51  ;;  %782 = vst [vmem:[#allocation4 + $0x6c] sm:$0xf] %v2196_v34  ;;  %v2198_v43 = vpack.c.bf16 %v704_v40, %v704_v40  ;;  %v699_v51 = vmax.f32 %v683_v49, 0.0  ;;  %1613 = vmatprep.mubr.bf16.mxu1 %v2538_v31 }
  0xc5   : > { %v2579_v60 = vpop.eup %2578  ;;  %2592 = vrcp.f32 %v1102_v1  ;;  %772 = vst [vmem:[#allocation4 + $0x1c] sm:$0xf] %v2186_v2  ;;  %777 = vst [vmem:[#allocation4 + $0x44] sm:$0xf] %v2191_v48  ;;  %v662_v1 = vmul.f32 %v2289_v50, %v2742_v10 }
  0xc6   : > { %1190 = vperm.xlu1 %2511, %v2577_v24   ;;  %1205 = vperm.xlu0 %2510, %v2579_v60   ;;  %v2581_v5 = vpop.eup %2580  ;;  %2594 = vrcp.f32 %v1104_v0  ;;  %784 = vst [vmem:[#allocation4 + $0x7c] sm:$0xf] %v2198_v43  ;;  %v2193_v7 = vpack.c.bf16 %v699_v51, %v699_v51  ;;  %v2293_v24 = vunpack.c.l.bf16 %v2348_v16 }
  0xc7   : > { %2596 = vrcp.f32 %v1106_v21  ;;  %v685_v8 = vadd.f32 %v2749_v13, %v662_v1 }
  0xc8   : > { %2598 = vrcp.f32 %v1108_v37  ;;  %779 = vst [vmem:[#allocation4 + $0x54] sm:$0xf] %v2193_v7  ;;  %v664_v54 = vmul.f32 %v2293_v24, %v2742_v10 }
  0xc9   : > { %v2583_v17 = vpop.eup %2582  ;;  %v701_v53 = vmax.f32 %v685_v8, 0.0 }
  0xca   : > { %1195 = vperm.xlu1 %2511, %v2581_v5   ;;  %1215 = vperm.xlu0 %2510, %v2583_v17   ;;  %v2585_v25 = vpop.eup %2584  ;;  %v687_v56 = vadd.f32 %v2749_v13, %v664_v54 }
  0xcb   : > { %v2195_v55 = vpack.c.bf16 %v701_v53, %v701_v53  ;;  %v2542_v53 = vld [vmem:[#allocation4 + $0x34] ss:$8 sps:$4 sm:$0xff]  }
  0xcc   : > { %v703_v58 = vmax.f32 %v687_v56, 0.0 }
  0xcd   : > { %v2587_v33 = vpop.eup %2586  ;;  %781 = vst [vmem:[#allocation4 + $0x64] sm:$0xf] %v2195_v55 }
  0xce   : > { %v2589_v36 = vpop.eup %2588  ;;  %1170 = vperm.xlu1 %2511, %v2585_v25   ;;  %1225 = vperm.xlu0 %2510, %v2587_v33   ;;  %v2197_v59 = vpack.c.bf16 %v703_v58, %v703_v58 }
  0xd0   : > { %783 = vst [vmem:[#allocation4 + $0x74] sm:$0xf] %v2197_v59 }
  0xd1   : > { %v2591_v42 = vpop.eup %2590 }
  0xd2   : > { %1175 = vperm.xlu1 %2511, %v2589_v36   ;;  %1235 = vperm.xlu0 %2510, %v2591_v42   ;;  %v2593_v47 = vpop.eup %2592 }
  0xd3   : > { %v2595_v44 = vpop.eup %2594 }
  0xd4   : > { %v2597_v52 = vpop.eup %2596 }
  0xd5   : > { %v2599_v57 = vpop.eup %2598 }
  0xd6   : > { %1200 = vperm.xlu1 %2511, %v2593_v47  }
  0xda   : > { %1210 = vperm.xlu1 %2511, %v2595_v44  }
  0xde   : > { %1220 = vperm.xlu1 %2511, %v2597_v52  }
  0xe2   : > { %1230 = vperm.xlu1 %2511, %v2599_v57  }
  0xfc   : > { %v2454_v60 = vpop.f32.mrf.mxu0 }
  0xfe   : > { %v883_v61 = vpop.f32.mrf.mxu0 }
 0x100   : > { %v2937_v62 = vpop.f32.mrf.mxu0 }
 0x102   : > { %v886_v63 = vpop.f32.mrf.mxu0 }
 0x104   : > { %v2458_v0 = vpop.f32.mrf.mxu0 }
 0x106   : > { %v899_v3 = vpop.f32.mrf.mxu0 }
 0x108   : > { %v2459_v4 = vpop.f32.mrf.mxu0 }
 0x10a   : > { %v902_v5 = vpop.f32.mrf.mxu0 }
 0x10c   : > { %v2939_v10 = vpop.f32.mrf.mxu0 }
 0x10e   : > { %v2941_v6 = vpop.f32.mrf.mxu0 }
 0x110   : > { %v2463_v11 = vpop.f32.mrf.mxu0 }
 0x112   : > { %v918_v16 = vpop.f32.mrf.mxu0 }
 0x114   : > { %v2943_v20 = vpop.f32.mrf.mxu0 }
 0x116   : > { %v931_v25 = vpop.f32.mrf.mxu0 }
 0x118   : > { %v2467_v34 = vpop.f32.mrf.mxu0 }
 0x11a   : > { %v934_v2 = vpop.f32.mrf.mxu0 }
 0x131   : > { %v1181_v13 = vpop.permute.xlu0 %1180 }
 0x132   : > { %v1242_v9 = vmul.f32 %v1181_v13, %v899_v3 }
 0x134   : > { %v2203_v12 = vpack.c.bf16 %v1242_v9, %v1242_v9  ;;  %v2551_v9 = vld [vmem:[#allocation4 + $0x54] ss:$8 sps:$4 sm:$0xff]  }
 0x135   : > { %v1186_v14 = vpop.permute.xlu1 %1185 }
 0x136   : > { %1322 = vst [vmem:[#allocation4 + $0x20] sm:$0xf] %v2203_v12  ;;  %v1243_v15 = vmul.f32 %v1186_v14, %v902_v5  ;;  %v2557_v14 = vld [vmem:[#allocation4 + $0x74] ss:$8 sps:$4 sm:$0xff]  }
 0x138   : > { %v2204_v17 = vpack.c.bf16 %v1243_v15, %v1243_v15 }
 0x139   : > { %v1161_v18 = vpop.permute.xlu1 %1160 }
 0x13a   : > { %1323 = vst [vmem:[#allocation4 + $0x28] sm:$0xf] %v2204_v17  ;;  %v1238_v19 = vmul.f32 %v1161_v18, %v883_v61  ;;  %v2545_v61 = vld [vmem:[#allocation4 + $0x14] ss:$8 sps:$4 sm:$0xff]  }
 0x13c   : > { %v2199_v21 = vpack.c.bf16 %v1238_v19, %v1238_v19 }
 0x13d   : > { %v1166_v22 = vpop.permute.xlu1 %1165 }
 0x13e   : > { %1318 = vst [vmem:[#allocation4] sm:$0xf] %v2199_v21  ;;  %v1239_v23 = vmul.f32 %v1166_v22, %v886_v63 }
 0x140   : > { %v2200_v26 = vpack.c.bf16 %v1239_v23, %v1239_v23 }
 0x141   : > { %v1206_v27 = vpop.permute.xlu0 %1205  ;;  %v1191_v28 = vpop.permute.xlu1 %1190  ;;  %v2536_v29 = vld [vmem:[#allocation4 + $0x20] ss:$8 sps:$4 sm:$0xff]  }
 0x142   : > { %1319 = vst [vmem:[#allocation4 + $0x8] sm:$0xf] %v2200_v26  ;;  %v1244_v32 = vmul.f32 %v2458_v0, %v1191_v28  ;;  %v1247_v33 = vmul.f32 %v1206_v27, %v918_v16  ;;  %1614 = vmatmul.mubr.bf16.vlgmr.msra.gmra.mxu1 %v2536_v29 }
 0x143   : > { %1621 = vmatprep.mubr.bf16.mxu1 %v2542_v53 }
 0x144   : > { %v2205_v35 = vpack.c.bf16 %v1244_v32, %v1244_v32  ;;  %v2208_v36 = vpack.c.bf16 %v1247_v33, %v1247_v33 }
 0x145   : > { %v1216_v37 = vpop.permute.xlu0 %1215  ;;  %v1196_v38 = vpop.permute.xlu1 %1195 }
 0x146   : > { %1324 = vst [vmem:[#allocation4 + $0x30] sm:$0xf] %v2205_v35  ;;  %1327 = vst [vmem:[#allocation4 + $0x48] sm:$0xf] %v2208_v36  ;;  %v1249_v39 = vmul.f32 %v2463_v11, %v1216_v37  ;;  %v1245_v40 = vmul.f32 %v2459_v4, %v1196_v38  ;;  %v2548_v4 = vld [vmem:[#allocation4 + $0x44] ss:$8 sps:$4 sm:$0xff]  }
 0x147   : > { %v2554_v11 = vld [vmem:[#allocation4 + $0x64] ss:$8 sps:$4 sm:$0xff]  }
 0x148   : > { %v2210_v41 = vpack.c.bf16 %v1249_v39, %v1249_v39  ;;  %v2206_v30 = vpack.c.bf16 %v1245_v40, %v1245_v40 }
 0x149   : > { %v1226_v42 = vpop.permute.xlu0 %1225  ;;  %v1171_v43 = vpop.permute.xlu1 %1170  ;;  %v2539_v45 = vld [vmem:[#allocation4] ss:$8 sps:$4 sm:$0xff]  }
 0x14a   : > { %1329 = vst [vmem:[#allocation4 + $0x58] sm:$0xf] %v2210_v41  ;;  %1325 = vst [vmem:[#allocation4 + $0x38] sm:$0xf] %v2206_v30  ;;  %v1240_v47 = vmul.f32 %v2454_v60, %v1171_v43  ;;  %v1251_v48 = vmul.f32 %v1226_v42, %v934_v2  ;;  %1598 = vmatmul.mubr.bf16.vlgmr.msra.gmra.mxu0 %v2539_v45 }
 0x14b   : > { %1605 = vmatprep.mubr.bf16.mxu0 %v2545_v61 }
 0x14c   : > { %v2201_v49 = vpack.c.bf16 %v1240_v47, %v1240_v47  ;;  %v2212_v50 = vpack.c.bf16 %v1251_v48, %v1251_v48 }
 0x14d   : > { %v1236_v51 = vpop.permute.xlu0 %1235  ;;  %v1176_v44 = vpop.permute.xlu1 %1175 }
 0x14e   : > { %1320 = vst [vmem:[#allocation4 + $0x10] sm:$0xf] %v2201_v49  ;;  %1331 = vst [vmem:[#allocation4 + $0x68] sm:$0xf] %v2212_v50  ;;  %v1253_v1 = vmul.f32 %v2467_v34, %v1236_v51  ;;  %v1241_v7 = vmul.f32 %v2937_v62, %v1176_v44 }
 0x150   : > { %v2214_v8 = vpack.c.bf16 %v1253_v1, %v1253_v1  ;;  %v2202_v24 = vpack.c.bf16 %v1241_v7, %v1241_v7 }
 0x151   : > { %v1201_v52 = vpop.permute.xlu1 %1200  ;;  %v2544_v54 = vld [vmem:[#allocation4 + $0x30] ss:$8 sps:$4 sm:$0xff]  }
 0x152   : > { %1333 = vst [vmem:[#allocation4 + $0x78] sm:$0xf] %v2214_v8  ;;  %1321 = vst [vmem:[#allocation4 + $0x18] sm:$0xf] %v2202_v24  ;;  %v1246_v55 = vmul.f32 %v1201_v52, %v2941_v6  ;;  %1622 = vmatmul.mubr.bf16.gmra.mxu1 %v2544_v54 }
 0x153   : > { %1629 = vmatprep.mubr.bf16.mxu1 %v2548_v4 }
 0x154   : > { %v2207_v56 = vpack.c.bf16 %v1246_v55, %v1246_v55 }
 0x155   : > { %v1211_v57 = vpop.permute.xlu1 %1210 }
 0x156   : > { %1326 = vst [vmem:[#allocation4 + $0x40] sm:$0xf] %v2207_v56  ;;  %v1248_v58 = vmul.f32 %v2939_v10, %v1211_v57 }
 0x158   : > { %v2209_v59 = vpack.c.bf16 %v1248_v58, %v1248_v58 }
 0x159   : > { %v1221_v60 = vpop.permute.xlu1 %1220  ;;  %v2547_v62 = vld [vmem:[#allocation4 + $0x10] ss:$8 sps:$4 sm:$0xff]  }
 0x15a   : > { %1328 = vst [vmem:[#allocation4 + $0x50] sm:$0xf] %v2209_v59  ;;  %v1250_v63 = vmul.f32 %v1221_v60, %v931_v25  ;;  %1606 = vmatmul.mubr.bf16.gmra.mxu0 %v2547_v62 }
 0x15c   : > { %v2211_v0 = vpack.c.bf16 %v1250_v63, %v1250_v63 }
 0x15d   : > { %v1231_v3 = vpop.permute.xlu1 %1230  ;;  %v2550_v5 = vld [vmem:[#allocation4 + $0x40] ss:$8 sps:$4 sm:$0xff]  }
 0x15e   : > { %1330 = vst [vmem:[#allocation4 + $0x60] sm:$0xf] %v2211_v0  ;;  %v1252_v6 = vmul.f32 %v2943_v20, %v1231_v3  ;;  %1630 = vmatmul.mubr.bf16.gmra.mxu1 %v2550_v5  ;;  %v2952_v20 = vld [vmem:[%s3008_s6] ss:$0 sm:$0xff] }
 0x15f   : > { %1637 = vmatprep.mubr.bf16.mxu1 %v2551_v9 }
 0x160   : > { %v2213_v13 = vpack.c.bf16 %v1252_v6, %v1252_v6 }
 0x161   : > { %v2553_v10 = vld [vmem:[#allocation4 + $0x50] ss:$8 sps:$4 sm:$0xff]  }
 0x162   : > { %1332 = vst [vmem:[#allocation4 + $0x70] sm:$0xf] %v2213_v13 }
 0x165   : > { %v2556_v12 = vld [vmem:[#allocation4 + $0x60] ss:$8 sps:$4 sm:$0xff]  }
 0x166   : > { %1638 = vmatmul.mubr.bf16.gmra.mxu1 %v2553_v10 }
 0x167   : > { %1645 = vmatprep.mubr.bf16.mxu1 %v2554_v11 }
 0x169   : > { %v2559_v15 = vld [vmem:[#allocation4 + $0x70] ss:$8 sps:$4 sm:$0xff]  }
 0x16e   : > { %1646 = vmatmul.mubr.bf16.gmra.mxu1 %v2556_v12 }
 0x16f   : > { %1653 = vmatprep.mubr.bf16.mxu1 %v2557_v14 }
 0x176   : > { %1654 = vmatmul.mubr.bf16.gmra.mxu1 %v2559_v15 }
 0x202   : > { %v2400_v16 = vpop.f32.mrf.mxu1 }
 0x204   : > { %v2401_v17 = vpop.f32.mrf.mxu1 }
 0x205   : > { %v2402_v19 = vadd.f32 %v2401_v17, %v2400_v16 }
 0x206   : > { %v2403_v18 = vpop.f32.mrf.mxu1 }
 0x207   : > { %v1616_v25 = vadd.f32 %v2402_v19, %v2952_v20 }
 0x208   : > { %v2404_v21 = vpop.f32.mrf.mxu1 }
 0x209   : > { %v2405_v22 = vadd.f32 %v2404_v21, %v2403_v18  ;;  %v1828_v56 = vmul.f32 0.0, %v1616_v25 }
 0x20a   : > { %v2388_v23 = vpop.f32.mrf.mxu0 }
 0x20b   : > { %v2956_v26 = vadd.f32 %v2405_v22, %v2952_v20  ;;  %v1866_v12 = vmul.f32 %v1828_v56, %v1616_v25 }
 0x20c   : > { %v2389_v27 = vpop.f32.mrf.mxu0 }
 0x20d   : > { %v2308_v28 = vpack.c.bf16 %v2956_v26, %v1616_v25  ;;  %v2390_v31 = vadd.f32 %v2389_v27, %v2388_v23  ;;  %v1829_v3 = vmul.f32 0.0, %v2956_v26 }
 0x20e   : > { %v2391_v29 = vpop.f32.mrf.mxu0 }
 0x20f   : > { %2350 = vst [vmem:[%s2962_s25 + $0x10] sm:$0xff] %v2308_v28   ;;  %v1600_v35 = vadd.f32 %v2390_v31, %v2952_v20  ;;  %v1867_v21 = vmul.f32 %v1829_v3, %v2956_v26 }
 0x210   : > { %v2392_v32 = vpop.f32.mrf.mxu0 }
 0x211   : > { %v2393_v33 = vadd.f32 %v2392_v32, %v2391_v29  ;;  %v1862_v52 = vmul.f32 %v1600_v35, %v1600_v35 }
 0x212   : > { %v2406_v34 = vpop.f32.mrf.mxu1 }
 0x213   : > { %v1603_v36 = vadd.f32 %v2393_v33, %v2952_v20 }
 0x214   : > { %v2407_v37 = vpop.f32.mrf.mxu1 }
 0x215   : > { %v2298_v38 = vpack.c.bf16 %v1603_v36, %v1600_v35  ;;  %v2408_v40 = vadd.f32 %v2407_v37, %v2406_v34  ;;  %v1863_v1 = vmul.f32 %v1603_v36, %v1603_v36  ;;  %v1840_v53 = vadd.f32 %v1603_v36, %v1600_v35 }
 0x216   : > { %v2409_v39 = vpop.f32.mrf.mxu1 }
 0x217   : > { %2299 = vst [vmem:[%s2962_s25] sm:$0xff] %v2298_v38   ;;  %v1624_v42 = vadd.f32 %v2408_v40, %v2952_v20  ;;  %v1878_v59 = vadd.f32 %v1863_v1, %v1862_v52 }
 0x218   : > { %v2410_v2 = vpop.f32.mrf.mxu1 }
 0x219   : > { %v2411_v41 = vadd.f32 %v2410_v2, %v2409_v39  ;;  %v1830_v13 = vmul.f32 0.0, %v1624_v42 }
 0x21a   : > { %v2394_v30 = vpop.f32.mrf.mxu0 }
 0x21b   : > { %v1627_v43 = vadd.f32 %v2411_v41, %v2952_v20  ;;  %v1868_v27 = vmul.f32 %v1830_v13, %v1624_v42 }
 0x21c   : > { %v2395_v45 = vpop.f32.mrf.mxu0 }
 0x21d   : > { %v2313_v46 = vpack.c.bf16 %v1627_v43, %v1624_v42  ;;  %v2396_v47 = vadd.f32 %v2395_v45, %v2394_v30  ;;  %v1831_v17 = vmul.f32 0.0, %v1627_v43 }
 0x21e   : > { %v2397_v48 = vpop.f32.mrf.mxu0  ;;  %v2412_v49 = vpop.f32.mrf.mxu1 }
 0x21f   : > { %2351 = vst [vmem:[%s2962_s25 + $0x18] sm:$0xff] %v2313_v46   ;;  %v1608_v50 = vadd.f32 %v2396_v47, %v2952_v20  ;;  %v1869_v25 = vmul.f32 %v1831_v17, %v1627_v43 }
 0x220   : > { %v2398_v51 = vpop.f32.mrf.mxu0  ;;  %v2413_v44 = vpop.f32.mrf.mxu1 }
 0x221   : > { %v1826_v7 = vmul.f32 0.0, %v1608_v50  ;;  %v2399_v8 = vadd.f32 %v2398_v51, %v2397_v48  ;;  %v2414_v57 = vadd.f32 %v2413_v44, %v2412_v49 }
 0x222   : > { %v2415_v24 = vpop.f32.mrf.mxu1 }
 0x223   : > { %v1864_v54 = vmul.f32 %v1826_v7, %v1608_v50  ;;  %v1611_v55 = vadd.f32 %v2399_v8, %v2952_v20  ;;  %v1841_v60 = vadd.f32 %v1840_v53, %v1826_v7  ;;  %v1632_v9 = vadd.f32 %v2414_v57, %v2952_v20 }
 0x224   : > { %v2416_v58 = vpop.f32.mrf.mxu1 }
 0x225   : > { %v2303_v61 = vpack.c.bf16 %v1611_v55, %v1608_v50  ;;  %v1827_v62 = vmul.f32 0.0, %v1611_v55  ;;  %v2417_v63 = vadd.f32 %v2416_v58, %v2415_v24  ;;  %v1879_v4 = vadd.f32 %v1878_v59, %v1864_v54 }
 0x226   : > { %v2418_v0 = vpop.f32.mrf.mxu1  ;;  %v1832_v28 = vmul.f32 0.0, %v1632_v9 }
 0x227   : > { %2349 = vst [vmem:[%s2962_s25 + $0x8] sm:$0xff] %v2303_v61   ;;  %v1842_v5 = vadd.f32 %v1841_v60, %v1827_v62  ;;  %v1865_v6 = vmul.f32 %v1827_v62, %v1611_v55  ;;  %v1635_v10 = vadd.f32 %v2417_v63, %v2952_v20 }
 0x228   : > { %v2419_v11 = vpop.f32.mrf.mxu1  ;;  %v1870_v26 = vmul.f32 %v1832_v28, %v1632_v9 }
 0x229   : > { %v1843_v14 = vadd.f32 %v1842_v5, %v1828_v56  ;;  %v1880_v15 = vadd.f32 %v1879_v4, %v1865_v6  ;;  %v2420_v16 = vadd.f32 %v2419_v11, %v2418_v0  ;;  %v2318_v18 = vpack.c.bf16 %v1635_v10, %v1632_v9 }
 0x22a   : > { %v2421_v19 = vpop.f32.mrf.mxu1  ;;  %v1833_v38 = vmul.f32 0.0, %v1635_v10 }
 0x22b   : > { %v1844_v22 = vadd.f32 %v1843_v14, %v1829_v3  ;;  %v1881_v23 = vadd.f32 %v1880_v15, %v1866_v12  ;;  %2352 = vst [vmem:[%s2962_s25 + $0x20] sm:$0xff] %v2318_v18   ;;  %v1640_v33 = vadd.f32 %v2420_v16, %v2952_v20 }
 0x22c   : > { %v2422_v29 = vpop.f32.mrf.mxu1  ;;  %v1871_v50 = vmul.f32 %v1833_v38, %v1635_v10 }
 0x22d   : > { %v1882_v31 = vadd.f32 %v1881_v23, %v1867_v21  ;;  %v1845_v32 = vadd.f32 %v1844_v22, %v1830_v13  ;;  %v2423_v34 = vadd.f32 %v2422_v29, %v2421_v19  ;;  %v1834_v30 = vmul.f32 0.0, %v1640_v33 }
 0x22e   : > { %v2424_v35 = vpop.f32.mrf.mxu1 }
 0x22f   : > { %v1846_v36 = vadd.f32 %v1845_v32, %v1831_v17  ;;  %v1883_v37 = vadd.f32 %v1882_v31, %v1868_v27  ;;  %v1643_v39 = vadd.f32 %v2423_v34, %v2952_v20  ;;  %v1872_v7 = vmul.f32 %v1834_v30, %v1640_v33 }
 0x230   : > { %v2425_v40 = vpop.f32.mrf.mxu1 }
 0x231   : > { %v1847_v2 = vadd.f32 %v1846_v36, %v1832_v28  ;;  %v1884_v41 = vadd.f32 %v1883_v37, %v1869_v25  ;;  %v2323_v42 = vpack.c.bf16 %v1643_v39, %v1640_v33  ;;  %v1835_v45 = vmul.f32 0.0, %v1643_v39 }
 0x232   : > { %v2426_v46 = vadd.f32 %v2425_v40, %v2424_v35  ;;  %v2427_v47 = vpop.f32.mrf.mxu1 }
 0x233   : > { %v1885_v48 = vadd.f32 %v1884_v41, %v1870_v26  ;;  %v1848_v49 = vadd.f32 %v1847_v2, %v1833_v38  ;;  %2353 = vst [vmem:[%s2962_s25 + $0x28] sm:$0xff] %v2323_v42   ;;  %v1873_v24 = vmul.f32 %v1835_v45, %v1643_v39 }
 0x234   : > { %v1648_v43 = vadd.f32 %v2426_v46, %v2952_v20  ;;  %v2428_v51 = vpop.f32.mrf.mxu1 }
 0x235   : > { %v1886_v44 = vadd.f32 %v1885_v48, %v1871_v50  ;;  %v1849_v1 = vadd.f32 %v1848_v49, %v1834_v30  ;;  %v2429_v8 = vadd.f32 %v2428_v51, %v2427_v47 }
 0x236   : > { %v2430_v52 = vpop.f32.mrf.mxu1  ;;  %v1836_v55 = vmul.f32 0.0, %v1648_v43 }
 0x237   : > { %v1887_v53 = vadd.f32 %v1886_v44, %v1872_v7  ;;  %v1850_v54 = vadd.f32 %v1849_v1, %v1835_v45  ;;  %v1651_v56 = vadd.f32 %v2429_v8, %v2952_v20 }
 0x238   : > { %v2431_v57 = vpop.f32.mrf.mxu1  ;;  %v1874_v0 = vmul.f32 %v1836_v55, %v1648_v43 }
 0x239   : > { %v1888_v58 = vadd.f32 %v1887_v53, %v1873_v24  ;;  %v2328_v59 = vpack.c.bf16 %v1651_v56, %v1648_v43  ;;  %v1837_v60 = vmul.f32 0.0, %v1651_v56  ;;  %v2432_v61 = vadd.f32 %v2431_v57, %v2430_v52 }
 0x23a   : > { %v2433_v62 = vpop.f32.mrf.mxu1  ;;  %v1851_v63 = vadd.f32 %v1850_v54, %v1836_v55 }
 0x23b   : > { %2354 = vst [vmem:[%s2962_s25 + $0x30] sm:$0xff] %v2328_v59   ;;  %v1656_v3 = vadd.f32 %v2432_v61, %v2952_v20  ;;  %v1889_v5 = vadd.f32 %v1888_v58, %v1874_v0  ;;  %v1875_v6 = vmul.f32 %v1837_v60, %v1651_v56 }
 0x23c   : > { %v2434_v4 = vpop.f32.mrf.mxu1  ;;  %v1852_v10 = vadd.f32 %v1851_v63, %v1837_v60 }
 0x23d   : > { %v2435_v13 = vadd.f32 %v2434_v4, %v2433_v62  ;;  %v1838_v9 = vmul.f32 0.0, %v1656_v3  ;;  %v1890_v14 = vadd.f32 %v1889_v5, %v1875_v6 }
 0x23f   : > { %v1659_v11 = vadd.f32 %v2435_v13, %v2952_v20  ;;  %v1876_v12 = vmul.f32 %v1838_v9, %v1656_v3  ;;  %v1853_v15 = vadd.f32 %v1852_v10, %v1838_v9 }
 0x241   : > { %v2333_v16 = vpack.c.bf16 %v1659_v11, %v1656_v3  ;;  %v1839_v17 = vmul.f32 0.0, %v1659_v11  ;;  %v1891_v18 = vadd.f32 %v1890_v14, %v1876_v12 }
 0x243   : > { %2355 = vst [vmem:[%s2962_s25 + $0x38] sm:$0xff] %v2333_v16   ;;  %v1854_v19 = vadd.f32 %v1853_v15, %v1839_v17  ;;  %v1877_v21 = vmul.f32 %v1839_v17, %v1659_v11 }
 0x245   : > { %v1855_v22 = vrot.slane %v1854_v19, 4  ;;  %v1892_v23 = vadd.f32 %v1891_v18, %v1877_v21 }
 0x247   : > { %v1856_v27 = vadd.f32 %v1855_v22, %v1854_v19  ;;  %v1893_v28 = vrot.slane %v1892_v23, 4 }
 0x249   : > { %v1857_v29 = vrot.slane %v1856_v27, 2  ;;  %v1894_v31 = vadd.f32 %v1893_v28, %v1892_v23 }
 0x24b   : > { %v1858_v32 = vadd.f32 %v1857_v29, %v1856_v27  ;;  %v1895_v33 = vrot.slane %v1894_v31, 2 }
 0x24d   : > { %v1859_v20 = vrot.slane %v1858_v32, 1  ;;  %v1896_v34 = vadd.f32 %v1895_v33, %v1894_v31 }
 0x24f   : > { %v1860_v25 = vadd.f32 %v1859_v20, %v1858_v32  ;;  %v1897_v35 = vrot.slane %v1896_v34, 1 }
 0x251   : > { %1861 = vst [vmem:[%s453_s11] sm:$0x1] %v1860_v25  ;;  %v1898_v36 = vadd.f32 %v1897_v35, %v1896_v34 }
 0x253   : > { %1899 = vst [vmem:[%s453_s11 + $0x1] sm:$0x1] %v1898_v36 }
 0x254 PF: > { %s19_s29 = sadd.s32 1, %s2622_s29   ;;  %s3011_s27 = smov %s2618_s28 }
 0x255   : > { %p16_p5 = scmp.ge.s32.totalorder %s19_s29, 4   ;;  %s3012_s28 = smov %s3014_s30 }
 0x257   :  { %18 = sbr.rel (!%p16_p5) target bundleno = 2 (0x2), region = 104 }

</bundles_post_ra>
